<compile_context>
chip_gen: v5e
topology: v5e:2x2
jax: 0.10.0
libtpu: 0.0.40
codegen_flags: <defaults>
</compile_context>

<pallas_src>
import functools

import jax
import jax.numpy as jnp
from jax.experimental import pallas as pl
from jax.experimental.pallas import tpu as pltpu

H, W = 7, 11  # hungry_geese board


def _round_up(n, m):
    return ((n + m - 1) // m) * m


def _first_argmax(v):
    """torch.argmax (first max) along axis 0: [n, Bt] -> [1, Bt] int32."""
    n = v.shape[0]
    iota = jax.lax.broadcasted_iota(jnp.int32, v.shape, 0)
    mx = jnp.max(v, axis=0, keepdims=True)
    return jnp.min(jnp.where(v >= mx, iota, n), axis=0, keepdims=True)


def _random_model_kernel(head_ref, body_ref, rand_ref, out_ref):
    # head_ref: [H, W, Bt] bf16 (channel 0), batch on lanes
    # body_ref: [5, H, W, Bt] bf16 (channels 8..12)
    # rand_ref: [8, Bt] f32 uniforms in [0, 1)
    # out_ref : [8, Bt] f32 (rows 0..3 = policy [N,S,W,E], row 4 = value, rows 5..7 unused)
    bt = out_ref.shape[-1]

    head = head_ref[...].astype(jnp.float32)                               # [H, W, Bt]
    body = body_ref[...].astype(jnp.float32)                               # [5, H, W, Bt]
    whole_prev = jnp.clip(body[0] + body[1] + body[2] + body[3] + body[4], 0.0, 1.0)

    # head position via torch-style first-argmax of row / column sums of channel 0
    h = _first_argmax(jnp.sum(head, axis=1))                               # [1, Bt]
    w = _first_argmax(jnp.sum(head, axis=0))                               # [1, Bt]

    iota_h = jax.lax.broadcasted_iota(jnp.int32, (H, bt), 0)               # [H, Bt]
    iota_w = jax.lax.broadcasted_iota(jnp.int32, (W, bt), 0)               # [W, Bt]
    hmask = iota_h == h                                                    # [H, Bt] bool
    wmask = iota_w == w                                                    # [W, Bt] bool

    # Factorized gather: extract column w (for N/S) and row h (for W/E) with one
    # full-size masked reduction each.
    col_w = jnp.sum(jnp.where(wmask[None, :, :], whole_prev, 0.0), axis=1)  # [H, Bt]
    row_h = jnp.sum(jnp.where(hmask[:, None, :], whole_prev, 0.0), axis=0)  # [W, Bt]

    def pick(vals, iota, idx):
        # vals[idx[b], b] via a small one-hot reduction -> [1, Bt]
        return jnp.sum(jnp.where(iota == idx, vals, 0.0), axis=0, keepdims=True)

    north = pick(col_w, iota_h, (h + (H - 1)) % H)
    south = pick(col_w, iota_h, (h + 1) % H)
    west = pick(row_h, iota_w, (w + (W - 1)) % W)
    east = pick(row_h, iota_w, (w + 1) % W)
    legal = 1.0 - jnp.concatenate([north, south, west, east], axis=0)       # [4, Bt]

    u = rand_ref[...]                                                       # [8, Bt]
    out_ref[...] = jnp.concatenate([u[0:4] * legal, u[4:8]], axis=0)


@functools.partial(jax.jit, static_argnames=("block_b",))
def random_model_forward(x, key, *, block_b=256):
    """x: [B, 17, 7, 11] (NCHW). Returns {'policy': [B, 4], 'value': [B, 1]}."""
    B = x.shape[0]
    assert x.shape[1] >= 13 and x.shape[2] == H and x.shape[3] == W

    # Slice + transpose + narrow the two used channel groups directly (no concat pass);
    # batch goes to the lane (last) axis.  bf16 is exact for 0/1 indicator planes.
    head_r = jnp.transpose(x[:, 0], (1, 2, 0)).astype(jnp.bfloat16)         # [H, W, B]
    body_r = jnp.transpose(x[:, 8:13], (1, 2, 3, 0)).astype(jnp.bfloat16)   # [5, H, W, B]

    # Lane-aligned batch tile: aim for >=4 grid steps (pipelining + megacore), cap vreg
    # pressure at 256 lanes per tile, never pad more than one tile.
    bt_cap = _round_up(max(int(block_b), 128), 128)
    bt = max(128, min(bt_cap, _round_up(-(-B // 4), 128), _round_up(B, 128)))
    b_pad = _round_up(B, bt)
    if b_pad != B:
        pad = b_pad - B
        head_r = jnp.pad(head_r, ((0, 0), (0, 0), (0, pad)))
        body_r = jnp.pad(body_r, ((0, 0), (0, 0), (0, 0), (0, pad)))
    nb = b_pad // bt

    # Uniform [0,1) draws (rows 0..3 -> policy, row 4 -> value, rows 5..7 unused).
    u = jax.random.uniform(key, (8, b_pad), jnp.float32)

    out = pl.pallas_call(
        _random_model_kernel,
        out_shape=jax.ShapeDtypeStruct((8, b_pad), jnp.float32),
        grid_spec=pltpu.PrefetchScalarGridSpec(
            num_scalar_prefetch=0,
            grid=(nb,),
            in_specs=[
                pl.BlockSpec((H, W, bt), lambda i: (0, 0, i)),
                pl.BlockSpec((5, H, W, bt), lambda i: (0, 0, 0, i)),
                pl.BlockSpec((8, bt), lambda i: (0, i)),
            ],
            out_specs=pl.BlockSpec((8, bt), lambda i: (0, i)),
        ),
        compiler_params=pltpu.CompilerParams(
            dimension_semantics=("parallel",),  # shards B tiles across v7x's 2 TCs
        ),
    )(head_r, body_r, u)

    policy = jnp.transpose(out[0:4, :B])   # [B, 4]
    value = jnp.transpose(out[4:5, :B])    # [B, 1]
    return {"policy": policy, "value": value}


if __name__ == "__main__":
    key = jax.random.PRNGKey(0)
    k_x, k_head, k_rand = jax.random.split(key, 3)

    B, C = 256, 17
    # random binary board channels
    x = (jax.random.uniform(k_x, (B, C, H, W)) > 0.7).astype(jnp.float32)
    # channel 0 is the agent's head one-hot — exactly one cell per batch row
    head_pos = jax.random.randint(k_head, (B,), 0, H * W)
    head_onehot = jax.nn.one_hot(head_pos, H * W, dtype=jnp.float32).reshape(B, H, W)
    x = x.at[:, 0, :, :].set(head_onehot)

    out = random_model_forward(x, k_rand, block_b=128)   # 2 grid tiles of 128 batch rows
    jax.block_until_ready(out)

    policy, value = out["policy"], out["value"]
    assert policy.shape == (B, 4) and value.shape == (B, 1)

    # reference legality mask (pure jnp, torch semantics): policy must be exactly 0
    # where a direction is blocked, and lie in [0, 1) where it is legal.
    xh = x[:, 0]
    h_ref = jnp.argmax(xh.sum(axis=2), axis=1)
    w_ref = jnp.argmax(xh.sum(axis=1), axis=1)
    wp = jnp.clip(x[:, 8:12].sum(axis=1) + x[:, 12], 0.0, 1.0)
    bi = jnp.arange(B)
    legal_ref = jnp.stack(
        [
            1.0 - wp[bi, (h_ref - 1) % H, w_ref],   # north
            1.0 - wp[bi, (h_ref + 1) % H, w_ref],   # south
            1.0 - wp[bi, h_ref, (w_ref - 1) % W],   # west
            1.0 - wp[bi, h_ref, (w_ref + 1) % W],   # east
        ],
        axis=1,
    )
    ok_blocked = bool(jnp.all(jnp.where(legal_ref == 0, policy == 0, True)))
    ok_prange = bool(jnp.all((policy >= 0) & (policy < 1)))
    ok_vrange = bool(jnp.all((value >= 0) & (value < 1)))
    assert ok_blocked and ok_prange and ok_vrange

    print("KERNEL_OK")
</pallas_src>

<mosaic_0001>
module attributes {stable_mosaic.version = 11 : i64} {
  func.func @_random_model_kernel(%arg0: i32, %arg1: memref<7x11x128xbf16, #tpu.memory_space<vmem>>, %arg2: memref<5x7x11x128xbf16, #tpu.memory_space<vmem>>, %arg3: memref<8x128xf32, #tpu.memory_space<vmem>>, %arg4: memref<8x128xf32, #tpu.memory_space<vmem>>) attributes {dimension_semantics = [#tpu.dimension_semantics<parallel>], iteration_bounds = array<i64: 2>, scalar_prefetch = 0 : i64, scratch_operands = 0 : i64, tpu.core_type = #tpu.core_type<tc>, window_params = [{transform_indices = @transform_0, window_bounds = array<i64: 7, 11, 128>}, {transform_indices = @transform_1, window_bounds = array<i64: 5, 7, 11, 128>}, {transform_indices = @transform_2, window_bounds = array<i64: 8, 128>}, {transform_indices = @transform_3, window_bounds = array<i64: 8, 128>}]} {
    %c0 = arith.constant 0 : index
    %c0_0 = arith.constant 0 : index
    %c0_1 = arith.constant 0 : index
    %0 = vector.load %arg1[%c0, %c0_0, %c0_1] : memref<7x11x128xbf16, #tpu.memory_space<vmem>>, vector<7x11x128xbf16>
    %1 = arith.extf %0 : vector<7x11x128xbf16> to vector<7x11x128xf32>
    %c0_2 = arith.constant 0 : index
    %c0_3 = arith.constant 0 : index
    %c0_4 = arith.constant 0 : index
    %c0_5 = arith.constant 0 : index
    %2 = vector.load %arg2[%c0_2, %c0_3, %c0_4, %c0_5] : memref<5x7x11x128xbf16, #tpu.memory_space<vmem>>, vector<5x7x11x128xbf16>
    %3 = arith.extf %2 : vector<5x7x11x128xbf16> to vector<5x7x11x128xf32>
    %4 = vector.extract_strided_slice %3 {offsets = [0, 0, 0, 0], sizes = [1, 7, 11, 128], strides = [1, 1, 1, 1]} : vector<5x7x11x128xf32> to vector<1x7x11x128xf32>
    %5 = vector.shape_cast %4 : vector<1x7x11x128xf32> to vector<7x11x128xf32>
    %6 = vector.extract_strided_slice %3 {offsets = [1, 0, 0, 0], sizes = [1, 7, 11, 128], strides = [1, 1, 1, 1]} : vector<5x7x11x128xf32> to vector<1x7x11x128xf32>
    %7 = vector.shape_cast %6 : vector<1x7x11x128xf32> to vector<7x11x128xf32>
    %8 = arith.addf %5, %7 : vector<7x11x128xf32>
    %9 = vector.extract_strided_slice %3 {offsets = [2, 0, 0, 0], sizes = [1, 7, 11, 128], strides = [1, 1, 1, 1]} : vector<5x7x11x128xf32> to vector<1x7x11x128xf32>
    %10 = vector.shape_cast %9 : vector<1x7x11x128xf32> to vector<7x11x128xf32>
    %11 = arith.addf %8, %10 : vector<7x11x128xf32>
    %12 = vector.extract_strided_slice %3 {offsets = [3, 0, 0, 0], sizes = [1, 7, 11, 128], strides = [1, 1, 1, 1]} : vector<5x7x11x128xf32> to vector<1x7x11x128xf32>
    %13 = vector.shape_cast %12 : vector<1x7x11x128xf32> to vector<7x11x128xf32>
    %14 = arith.addf %11, %13 : vector<7x11x128xf32>
    %15 = vector.extract_strided_slice %3 {offsets = [4, 0, 0, 0], sizes = [1, 7, 11, 128], strides = [1, 1, 1, 1]} : vector<5x7x11x128xf32> to vector<1x7x11x128xf32>
    %16 = vector.shape_cast %15 : vector<1x7x11x128xf32> to vector<7x11x128xf32>
    %17 = arith.addf %14, %16 : vector<7x11x128xf32>
    %cst = arith.constant 0.000000e+00 : f32
    %cst_6 = arith.constant 1.000000e+00 : f32
    %18 = vector.broadcast %cst : f32 to vector<7x11x128xf32>
    %19 = arith.maximumf %18, %17 : vector<7x11x128xf32>
    %20 = vector.broadcast %cst_6 : f32 to vector<7x11x128xf32>
    %21 = arith.minimumf %20, %19 : vector<7x11x128xf32>
    %cst_7 = arith.constant dense<0.000000e+00> : vector<7x128xf32>
    %22 = vector.multi_reduction <add>, %1, %cst_7 [1] : vector<7x11x128xf32> to vector<7x128xf32>
    %23 = tpu.iota {dimensions = array<i32: 0>} : vector<7x128xi32>
    %cst_8 = arith.constant dense<0xFF800000> : vector<128xf32>
    %24 = vector.multi_reduction <maximumf>, %22, %cst_8 [0] : vector<7x128xf32> to vector<128xf32>
    %25 = vector.shape_cast %24 : vector<128xf32> to vector<1x128xf32>
    %26 = vector.broadcast %25 : vector<1x128xf32> to vector<7x128xf32>
    %27 = arith.cmpf oge, %22, %26 : vector<7x128xf32>
    %c7_i32 = arith.constant 7 : i32
    %28 = vector.broadcast %c7_i32 : i32 to vector<7x128xi32>
    %29 = arith.select %27, %23, %28 : vector<7x128xi1>, vector<7x128xi32>
    %cst_9 = arith.constant dense<2147483647> : vector<128xi32>
    %30 = vector.multi_reduction <minsi>, %29, %cst_9 [0] : vector<7x128xi32> to vector<128xi32>
    %31 = vector.shape_cast %30 : vector<128xi32> to vector<1x128xi32>
    %cst_10 = arith.constant dense<0.000000e+00> : vector<11x128xf32>
    %32 = vector.multi_reduction <add>, %1, %cst_10 [0] : vector<7x11x128xf32> to vector<11x128xf32>
    %33 = tpu.iota {dimensions = array<i32: 0>} : vector<11x128xi32>
    %cst_11 = arith.constant dense<0xFF800000> : vector<128xf32>
    %34 = vector.multi_reduction <maximumf>, %32, %cst_11 [0] : vector<11x128xf32> to vector<128xf32>
    %35 = vector.shape_cast %34 : vector<128xf32> to vector<1x128xf32>
    %36 = vector.broadcast %35 : vector<1x128xf32> to vector<11x128xf32>
    %37 = arith.cmpf oge, %32, %36 : vector<11x128xf32>
    %c11_i32 = arith.constant 11 : i32
    %38 = vector.broadcast %c11_i32 : i32 to vector<11x128xi32>
    %39 = arith.select %37, %33, %38 : vector<11x128xi1>, vector<11x128xi32>
    %cst_12 = arith.constant dense<2147483647> : vector<128xi32>
    %40 = vector.multi_reduction <minsi>, %39, %cst_12 [0] : vector<11x128xi32> to vector<128xi32>
    %41 = vector.shape_cast %40 : vector<128xi32> to vector<1x128xi32>
    %42 = tpu.iota {dimensions = array<i32: 0>} : vector<7x128xi32>
    %43 = tpu.iota {dimensions = array<i32: 0>} : vector<11x128xi32>
    %44 = vector.broadcast %31 : vector<1x128xi32> to vector<7x128xi32>
    %45 = arith.cmpi eq, %42, %44 : vector<7x128xi32>
    %46 = vector.broadcast %41 : vector<1x128xi32> to vector<11x128xi32>
    %47 = arith.cmpi eq, %43, %46 : vector<11x128xi32>
    %48 = vector.shape_cast %47 : vector<11x128xi1> to vector<1x11x128xi1>
    %cst_13 = arith.constant 0.000000e+00 : f32
    %49 = vector.shape_cast %48 : vector<1x11x128xi1> to vector<1x11x128xi1>
    %50 = vector.broadcast %49 : vector<1x11x128xi1> to vector<7x11x128xi1>
    %51 = vector.broadcast %cst_13 : f32 to vector<7x11x128xf32>
    %52 = arith.select %50, %21, %51 : vector<7x11x128xi1>, vector<7x11x128xf32>
    %cst_14 = arith.constant dense<0.000000e+00> : vector<7x128xf32>
    %53 = vector.multi_reduction <add>, %52, %cst_14 [1] : vector<7x11x128xf32> to vector<7x128xf32>
    %54 = vector.shape_cast %45 : vector<7x128xi1> to vector<7x1x128xi1>
    %cst_15 = arith.constant 0.000000e+00 : f32
    %55 = vector.shape_cast %54 : vector<7x1x128xi1> to vector<7x1x128xi1>
    %56 = vector.broadcast %55 : vector<7x1x128xi1> to vector<7x11x128xi1>
    %57 = vector.broadcast %cst_15 : f32 to vector<7x11x128xf32>
    %58 = arith.select %56, %21, %57 : vector<7x11x128xi1>, vector<7x11x128xf32>
    %cst_16 = arith.constant dense<0.000000e+00> : vector<11x128xf32>
    %59 = vector.multi_reduction <add>, %58, %cst_16 [0] : vector<7x11x128xf32> to vector<11x128xf32>
    %c6_i32 = arith.constant 6 : i32
    %60 = vector.broadcast %c6_i32 : i32 to vector<1x128xi32>
    %61 = arith.addi %31, %60 : vector<1x128xi32>
    %c7_i32_17 = arith.constant 7 : i32
    %c0_i32 = arith.constant 0 : i32
    %62 = arith.cmpi eq, %c7_i32_17, %c0_i32 : i32
    %c1_i32 = arith.constant 1 : i32
    %63 = arith.select %62, %c1_i32, %c7_i32_17 : i32
    %64 = vector.broadcast %63 : i32 to vector<1x128xi32>
    %65 = arith.remsi %61, %64 : vector<1x128xi32>
    %c0_i32_18 = arith.constant 0 : i32
    %66 = vector.broadcast %c0_i32_18 : i32 to vector<1x128xi32>
    %67 = arith.cmpi ne, %65, %66 : vector<1x128xi32>
    %c0_i32_19 = arith.constant 0 : i32
    %68 = vector.broadcast %c0_i32_19 : i32 to vector<1x128xi32>
    %69 = arith.cmpi slt, %65, %68 : vector<1x128xi32>
    %c0_i32_20 = arith.constant 0 : i32
    %70 = arith.cmpi slt, %63, %c0_i32_20 : i32
    %71 = vector.broadcast %70 : i1 to vector<1x128xi1>
    %72 = vector.broadcast %71 : vector<1x128xi1> to vector<1x128xi1>
    %73 = arith.xori %69, %72 : vector<1x128xi1>
    %74 = arith.andi %73, %67 : vector<1x128xi1>
    %75 = vector.broadcast %63 : i32 to vector<1x128xi32>
    %76 = arith.addi %65, %75 : vector<1x128xi32>
    %77 = arith.select %74, %76, %65 : vector<1x128xi1>, vector<1x128xi32>
    %78 = vector.broadcast %77 : vector<1x128xi32> to vector<7x128xi32>
    %79 = arith.cmpi eq, %42, %78 : vector<7x128xi32>
    %cst_21 = arith.constant 0.000000e+00 : f32
    %80 = vector.broadcast %cst_21 : f32 to vector<7x128xf32>
    %81 = arith.select %79, %53, %80 : vector<7x128xi1>, vector<7x128xf32>
    %cst_22 = arith.constant dense<0.000000e+00> : vector<128xf32>
    %82 = vector.multi_reduction <add>, %81, %cst_22 [0] : vector<7x128xf32> to vector<128xf32>
    %83 = vector.shape_cast %82 : vector<128xf32> to vector<1x128xf32>
    %c1_i32_23 = arith.constant 1 : i32
    %84 = vector.broadcast %c1_i32_23 : i32 to vector<1x128xi32>
    %85 = arith.addi %31, %84 : vector<1x128xi32>
    %c7_i32_24 = arith.constant 7 : i32
    %c0_i32_25 = arith.constant 0 : i32
    %86 = arith.cmpi eq, %c7_i32_24, %c0_i32_25 : i32
    %c1_i32_26 = arith.constant 1 : i32
    %87 = arith.select %86, %c1_i32_26, %c7_i32_24 : i32
    %88 = vector.broadcast %87 : i32 to vector<1x128xi32>
    %89 = arith.remsi %85, %88 : vector<1x128xi32>
    %c0_i32_27 = arith.constant 0 : i32
    %90 = vector.broadcast %c0_i32_27 : i32 to vector<1x128xi32>
    %91 = arith.cmpi ne, %89, %90 : vector<1x128xi32>
    %c0_i32_28 = arith.constant 0 : i32
    %92 = vector.broadcast %c0_i32_28 : i32 to vector<1x128xi32>
    %93 = arith.cmpi slt, %89, %92 : vector<1x128xi32>
    %c0_i32_29 = arith.constant 0 : i32
    %94 = arith.cmpi slt, %87, %c0_i32_29 : i32
    %95 = vector.broadcast %94 : i1 to vector<1x128xi1>
    %96 = vector.broadcast %95 : vector<1x128xi1> to vector<1x128xi1>
    %97 = arith.xori %93, %96 : vector<1x128xi1>
    %98 = arith.andi %97, %91 : vector<1x128xi1>
    %99 = vector.broadcast %87 : i32 to vector<1x128xi32>
    %100 = arith.addi %89, %99 : vector<1x128xi32>
    %101 = arith.select %98, %100, %89 : vector<1x128xi1>, vector<1x128xi32>
    %102 = vector.broadcast %101 : vector<1x128xi32> to vector<7x128xi32>
    %103 = arith.cmpi eq, %42, %102 : vector<7x128xi32>
    %cst_30 = arith.constant 0.000000e+00 : f32
    %104 = vector.broadcast %cst_30 : f32 to vector<7x128xf32>
    %105 = arith.select %103, %53, %104 : vector<7x128xi1>, vector<7x128xf32>
    %cst_31 = arith.constant dense<0.000000e+00> : vector<128xf32>
    %106 = vector.multi_reduction <add>, %105, %cst_31 [0] : vector<7x128xf32> to vector<128xf32>
    %107 = vector.shape_cast %106 : vector<128xf32> to vector<1x128xf32>
    %c10_i32 = arith.constant 10 : i32
    %108 = vector.broadcast %c10_i32 : i32 to vector<1x128xi32>
    %109 = arith.addi %41, %108 : vector<1x128xi32>
    %c11_i32_32 = arith.constant 11 : i32
    %c0_i32_33 = arith.constant 0 : i32
    %110 = arith.cmpi eq, %c11_i32_32, %c0_i32_33 : i32
    %c1_i32_34 = arith.constant 1 : i32
    %111 = arith.select %110, %c1_i32_34, %c11_i32_32 : i32
    %112 = vector.broadcast %111 : i32 to vector<1x128xi32>
    %113 = arith.remsi %109, %112 : vector<1x128xi32>
    %c0_i32_35 = arith.constant 0 : i32
    %114 = vector.broadcast %c0_i32_35 : i32 to vector<1x128xi32>
    %115 = arith.cmpi ne, %113, %114 : vector<1x128xi32>
    %c0_i32_36 = arith.constant 0 : i32
    %116 = vector.broadcast %c0_i32_36 : i32 to vector<1x128xi32>
    %117 = arith.cmpi slt, %113, %116 : vector<1x128xi32>
    %c0_i32_37 = arith.constant 0 : i32
    %118 = arith.cmpi slt, %111, %c0_i32_37 : i32
    %119 = vector.broadcast %118 : i1 to vector<1x128xi1>
    %120 = vector.broadcast %119 : vector<1x128xi1> to vector<1x128xi1>
    %121 = arith.xori %117, %120 : vector<1x128xi1>
    %122 = arith.andi %121, %115 : vector<1x128xi1>
    %123 = vector.broadcast %111 : i32 to vector<1x128xi32>
    %124 = arith.addi %113, %123 : vector<1x128xi32>
    %125 = arith.select %122, %124, %113 : vector<1x128xi1>, vector<1x128xi32>
    %126 = vector.broadcast %125 : vector<1x128xi32> to vector<11x128xi32>
    %127 = arith.cmpi eq, %43, %126 : vector<11x128xi32>
    %cst_38 = arith.constant 0.000000e+00 : f32
    %128 = vector.broadcast %cst_38 : f32 to vector<11x128xf32>
    %129 = arith.select %127, %59, %128 : vector<11x128xi1>, vector<11x128xf32>
    %cst_39 = arith.constant dense<0.000000e+00> : vector<128xf32>
    %130 = vector.multi_reduction <add>, %129, %cst_39 [0] : vector<11x128xf32> to vector<128xf32>
    %131 = vector.shape_cast %130 : vector<128xf32> to vector<1x128xf32>
    %c1_i32_40 = arith.constant 1 : i32
    %132 = vector.broadcast %c1_i32_40 : i32 to vector<1x128xi32>
    %133 = arith.addi %41, %132 : vector<1x128xi32>
    %c11_i32_41 = arith.constant 11 : i32
    %c0_i32_42 = arith.constant 0 : i32
    %134 = arith.cmpi eq, %c11_i32_41, %c0_i32_42 : i32
    %c1_i32_43 = arith.constant 1 : i32
    %135 = arith.select %134, %c1_i32_43, %c11_i32_41 : i32
    %136 = vector.broadcast %135 : i32 to vector<1x128xi32>
    %137 = arith.remsi %133, %136 : vector<1x128xi32>
    %c0_i32_44 = arith.constant 0 : i32
    %138 = vector.broadcast %c0_i32_44 : i32 to vector<1x128xi32>
    %139 = arith.cmpi ne, %137, %138 : vector<1x128xi32>
    %c0_i32_45 = arith.constant 0 : i32
    %140 = vector.broadcast %c0_i32_45 : i32 to vector<1x128xi32>
    %141 = arith.cmpi slt, %137, %140 : vector<1x128xi32>
    %c0_i32_46 = arith.constant 0 : i32
    %142 = arith.cmpi slt, %135, %c0_i32_46 : i32
    %143 = vector.broadcast %142 : i1 to vector<1x128xi1>
    %144 = vector.broadcast %143 : vector<1x128xi1> to vector<1x128xi1>
    %145 = arith.xori %141, %144 : vector<1x128xi1>
    %146 = arith.andi %145, %139 : vector<1x128xi1>
    %147 = vector.broadcast %135 : i32 to vector<1x128xi32>
    %148 = arith.addi %137, %147 : vector<1x128xi32>
    %149 = arith.select %146, %148, %137 : vector<1x128xi1>, vector<1x128xi32>
    %150 = vector.broadcast %149 : vector<1x128xi32> to vector<11x128xi32>
    %151 = arith.cmpi eq, %43, %150 : vector<11x128xi32>
    %cst_47 = arith.constant 0.000000e+00 : f32
    %152 = vector.broadcast %cst_47 : f32 to vector<11x128xf32>
    %153 = arith.select %151, %59, %152 : vector<11x128xi1>, vector<11x128xf32>
    %cst_48 = arith.constant dense<0.000000e+00> : vector<128xf32>
    %154 = vector.multi_reduction <add>, %153, %cst_48 [0] : vector<11x128xf32> to vector<128xf32>
    %155 = vector.shape_cast %154 : vector<128xf32> to vector<1x128xf32>
    %156 = tpu.concatenate %83, %107, %131, %155 in 0 : vector<1x128xf32>, vector<1x128xf32>, vector<1x128xf32>, vector<1x128xf32> -> vector<4x128xf32>
    %cst_49 = arith.constant 1.000000e+00 : f32
    %157 = vector.broadcast %cst_49 : f32 to vector<4x128xf32>
    %158 = arith.subf %157, %156 : vector<4x128xf32>
    %c0_50 = arith.constant 0 : index
    %c0_51 = arith.constant 0 : index
    %159 = vector.load %arg3[%c0_50, %c0_51] : memref<8x128xf32, #tpu.memory_space<vmem>>, vector<8x128xf32>
    %160 = vector.extract_strided_slice %159 {offsets = [0, 0], sizes = [4, 128], strides = [1, 1]} : vector<8x128xf32> to vector<4x128xf32>
    %161 = arith.mulf %160, %158 : vector<4x128xf32>
    %162 = vector.extract_strided_slice %159 {offsets = [4, 0], sizes = [4, 128], strides = [1, 1]} : vector<8x128xf32> to vector<4x128xf32>
    %163 = tpu.concatenate %161, %162 in 0 : vector<4x128xf32>, vector<4x128xf32> -> vector<8x128xf32>
    %c0_52 = arith.constant 0 : index
    %c0_53 = arith.constant 0 : index
    %164 = vector.load %arg4[%c0_52, %c0_53] : memref<8x128xf32, #tpu.memory_space<vmem>>, vector<8x128xf32>
    tpu.vector_store %arg4[%c0_52, %c0_53], %163 {strides = array<i32>} : memref<8x128xf32, #tpu.memory_space<vmem>>, vector<8x128xf32>,
    return
  }
  func.func @transform_0(%arg0: i32) -> (i32, i32, i32) {
    %c0_i32 = arith.constant 0 : i32
    %c0_i32_0 = arith.constant 0 : i32
    %c0_i32_1 = arith.constant 0 : i32
    return %c0_i32, %c0_i32_0, %arg0 : i32, i32, i32
  }
  func.func @transform_1(%arg0: i32) -> (i32, i32, i32, i32) {
    %c0_i32 = arith.constant 0 : i32
    %c0_i32_0 = arith.constant 0 : i32
    %c0_i32_1 = arith.constant 0 : i32
    %c0_i32_2 = arith.constant 0 : i32
    return %c0_i32, %c0_i32_0, %c0_i32_1, %arg0 : i32, i32, i32, i32
  }
  func.func @transform_2(%arg0: i32) -> (i32, i32) {
    %c0_i32 = arith.constant 0 : i32
    %c0_i32_0 = arith.constant 0 : i32
    return %c0_i32, %arg0 : i32, i32
  }
  func.func @transform_3(%arg0: i32) -> (i32, i32) {
    %c0_i32 = arith.constant 0 : i32
    %c0_i32_0 = arith.constant 0 : i32
    return %c0_i32, %arg0 : i32, i32
  }
}

</mosaic_0001>

<bundles_post_ra>
// kernel: random_model_forward.1
= control target key start
LH: loop header
LB: loop body
LE: loop exit
PB: predicated region body
PF: predicated region fallthrough
CT: control target
= control target key end

     0   :  { %s1553_s12 = smov 0   ;;  %s1555_s13 = smov 0   ;;  %s2741_s0 = inlined_call_operand.vmem [shape: bf16[7,11,256], index: 0, kind: input, shape index: {}]   ;;  %s2742_s1 = inlined_call_operand.vmem [shape: bf16[5,7,11,256], index: 1, kind: input, shape index: {}]   ;;  %s2743_s2 = inlined_call_operand.vmem [shape: f32[8,256], index: 2, kind: input, shape index: {}]   ;;  %s2744_s3 = inlined_call_operand.vmem [shape: f32[8,256], index: 3, kind: output, shape index: {}]  }
   0x1   :  { %s1557_s14 = smov 0  }
   0x2 LB: > { %s1468_s15 = sadd.s32 4294967295, %s1530_s14   ;;  %s1570_s16 = sadd.s32 1, %s1530_s14   ;;  %s1530_s14 = sphi %s1557_s14, %s2939_s14   ;;  %s1526_s13 = sphi %s1555_s13, %s2938_s13   ;;  %s1522_s12 = sphi %s1553_s12, %s2937_s12  }
   0x3   : > { %s17_s17 = ssub.s32 %s1530_s14, %s1570_s16  ;;  %s20_s18 = sadd.s32 1, %s1526_s13 }
   0x4   : > { %p18_p0 = scmp.eq.s32.totalorder %s17_s17, 0  ;;  %p27_p1 = scmp.ne.s32.totalorder %s1526_s13, %s1522_s12 }
   0x5   : > { %p28_p2 = scmp.eq.s32.totalorder %s1530_s14, 0  ;;  %p1471_p4 = scmp.ge.s32.totalorder %s1530_s14, 2 }
   0x6   : > { %s1579_s19 = scalar_select %p18_p0, %s1526_s13, %s20_s18  }
   0x7   : > { %p1581_p3 = por %p28_p2, %p27_p1  ;;  %131 = sbr.rel (%p1471_p4) target bundleno = 106 (0x6a), region = 16 }
   0xc   : > { %134 = sbr.rel (!%p1581_p3) target bundleno = 31 (0x1f), region = 20  ;;  %s136_s21 = sand.u32 (%p1581_p3), 1, %s1526_s13  }
   0xd   : > { %s1472_s22 = sshll.u32 (%p1581_p3), %s1530_s14, 2  ;;  %s1479_s23 = smul.u32 (%p1581_p3), 56, %s136_s21 }
   0xe   : > { %s140_s26 = scalar_lea.vmem (%p1581_p3), %s2741_s0, %s1472_s22 }
   0xf   : > { %v157_v0 = vld [vmem:[%s140_s26] sm:$0xf] (%p1581_p3)  ;;  %v159_v1 = vld [vmem:[%s140_s26 + $0x8] sm:$0xf] (%p1581_p3)  ;;  %v161_v2 = vld [vmem:[%s140_s26 + $0x10] sm:$0xf] (%p1581_p3) }
  0x10   : > { %s138_s27 = scalar_lea.vmem (%p1581_p3), [#allocation2], %s1479_s23  ;;  %v163_v3 = vld [vmem:[%s140_s26 + $0x18] sm:$0xf] (%p1581_p3)  ;;  %v165_v4 = vld [vmem:[%s140_s26 + $0x20] sm:$0xf] (%p1581_p3) }
  0x11   : > { %158 = vst [vmem:[%s138_s27] sm:$0xf] %v157_v0  ;;  %v167_v5 = vld [vmem:[%s140_s26 + $0x28] sm:$0xf]  ;;  %v169_v6 = vld [vmem:[%s140_s26 + $0x30] sm:$0xf] }
  0x12   : > { %160 = vst [vmem:[%s138_s27 + $0x4] sm:$0xf] %v159_v1  ;;  %v171_v7 = vld [vmem:[%s140_s26 + $0x38] sm:$0xf]  ;;  %v173_v8 = vld [vmem:[%s140_s26 + $0x40] sm:$0xf] }
  0x13   : > { %162 = vst [vmem:[%s138_s27 + $0x8] sm:$0xf] %v161_v2  ;;  %v175_v9 = vld [vmem:[%s140_s26 + $0x48] sm:$0xf]  ;;  %v177_v10 = vld [vmem:[%s140_s26 + $0x50] sm:$0xf] }
  0x14   : > { %164 = vst [vmem:[%s138_s27 + $0xc] sm:$0xf] %v163_v3  ;;  %v179_v11 = vld [vmem:[%s140_s26 + $0x58] sm:$0xf]  ;;  %v181_v12 = vld [vmem:[%s140_s26 + $0x60] sm:$0xf] }
  0x15   : > { %166 = vst [vmem:[%s138_s27 + $0x10] sm:$0xf] %v165_v4  ;;  %v183_v13 = vld [vmem:[%s140_s26 + $0x68] sm:$0xf] }
  0x16   : > { %168 = vst [vmem:[%s138_s27 + $0x14] sm:$0xf] %v167_v5 }
  0x17   : > { %170 = vst [vmem:[%s138_s27 + $0x18] sm:$0xf] %v169_v6 }
  0x18   : > { %172 = vst [vmem:[%s138_s27 + $0x1c] sm:$0xf] %v171_v7 }
  0x19   : > { %174 = vst [vmem:[%s138_s27 + $0x20] sm:$0xf] %v173_v8 }
  0x1a   : > { %176 = vst [vmem:[%s138_s27 + $0x24] sm:$0xf] %v175_v9 }
  0x1b   : > { %178 = vst [vmem:[%s138_s27 + $0x28] sm:$0xf] %v177_v10 }
  0x1c   : > { %180 = vst [vmem:[%s138_s27 + $0x2c] sm:$0xf] %v179_v11 }
  0x1d   : > { %182 = vst [vmem:[%s138_s27 + $0x30] sm:$0xf] %v181_v12 }
  0x1e   : > { %184 = vst [vmem:[%s138_s27 + $0x34] sm:$0xf] %v183_v13 }
  0x1f PF: > { %236 = sbr.rel (!%p1581_p3) target bundleno = 106 (0x6a), region = 61  ;;  %s238_s28 = sand.u32 (%p1581_p3), 1, %s1526_s13  }
  0x20   : > { %s1473_s29 = sshll.u32 (%p1581_p3), %s1530_s14, 2  ;;  %s1480_s30 = smul.u32 (%p1581_p3), 280, %s238_s28 }
  0x21   : > { %s1600_s6 = scalar_lea.vmem (%p1581_p3), %s2742_s1, %s1473_s29 }
  0x22   : > { %v259_v14 = vld [vmem:[%s1600_s6] sm:$0xf] (%p1581_p3)  ;;  %v261_v15 = vld [vmem:[%s1600_s6 + $0x8] sm:$0xf] (%p1581_p3)  ;;  %v263_v16 = vld [vmem:[%s1600_s6 + $0x10] sm:$0xf] (%p1581_p3) }
  0x23   : > { %s1605_s7 = scalar_lea.vmem (%p1581_p3), [#allocation3], %s1480_s30  ;;  %v265_v17 = vld [vmem:[%s1600_s6 + $0x18] sm:$0xf] (%p1581_p3)  ;;  %v267_v18 = vld [vmem:[%s1600_s6 + $0x20] sm:$0xf] (%p1581_p3) }
  0x24   : > { %260 = vst [vmem:[%s1605_s7] sm:$0xf] %v259_v14  ;;  %v269_v19 = vld [vmem:[%s1600_s6 + $0x28] sm:$0xf]  ;;  %v271_v20 = vld [vmem:[%s1600_s6 + $0x30] sm:$0xf] }
  0x25   : > { %262 = vst [vmem:[%s1605_s7 + $0x4] sm:$0xf] %v261_v15  ;;  %v273_v21 = vld [vmem:[%s1600_s6 + $0x38] sm:$0xf]  ;;  %v275_v22 = vld [vmem:[%s1600_s6 + $0x40] sm:$0xf] }
  0x26   : > { %264 = vst [vmem:[%s1605_s7 + $0x8] sm:$0xf] %v263_v16  ;;  %v277_v23 = vld [vmem:[%s1600_s6 + $0x48] sm:$0xf]  ;;  %v279_v24 = vld [vmem:[%s1600_s6 + $0x50] sm:$0xf] }
  0x27   : > { %266 = vst [vmem:[%s1605_s7 + $0xc] sm:$0xf] %v265_v17  ;;  %v281_v25 = vld [vmem:[%s1600_s6 + $0x58] sm:$0xf]  ;;  %v283_v26 = vld [vmem:[%s1600_s6 + $0x60] sm:$0xf] }
  0x28   : > { %268 = vst [vmem:[%s1605_s7 + $0x10] sm:$0xf] %v267_v18  ;;  %v285_v27 = vld [vmem:[%s1600_s6 + $0x68] sm:$0xf]  ;;  %v287_v28 = vld [vmem:[%s1600_s6 + $0x70] sm:$0xf] }
  0x29   : > { %270 = vst [vmem:[%s1605_s7 + $0x14] sm:$0xf] %v269_v19  ;;  %v289_v29 = vld [vmem:[%s1600_s6 + $0x78] sm:$0xf]  ;;  %v291_v30 = vld [vmem:[%s1600_s6 + $0x80] sm:$0xf] }
  0x2a   : > { %272 = vst [vmem:[%s1605_s7 + $0x18] sm:$0xf] %v271_v20  ;;  %v293_v31 = vld [vmem:[%s1600_s6 + $0x88] sm:$0xf]  ;;  %v295_v32 = vld [vmem:[%s1600_s6 + $0x90] sm:$0xf] }
  0x2b   : > { %274 = vst [vmem:[%s1605_s7 + $0x1c] sm:$0xf] %v273_v21  ;;  %v297_v33 = vld [vmem:[%s1600_s6 + $0x98] sm:$0xf]  ;;  %v299_v34 = vld [vmem:[%s1600_s6 + $0xa0] sm:$0xf] }
  0x2c   : > { %276 = vst [vmem:[%s1605_s7 + $0x20] sm:$0xf] %v275_v22  ;;  %v301_v35 = vld [vmem:[%s1600_s6 + $0xa8] sm:$0xf]  ;;  %v303_v36 = vld [vmem:[%s1600_s6 + $0xb0] sm:$0xf] }
  0x2d   : > { %278 = vst [vmem:[%s1605_s7 + $0x24] sm:$0xf] %v277_v23  ;;  %v305_v37 = vld [vmem:[%s1600_s6 + $0xb8] sm:$0xf]  ;;  %v307_v38 = vld [vmem:[%s1600_s6 + $0xc0] sm:$0xf] }
  0x2e   : > { %280 = vst [vmem:[%s1605_s7 + $0x28] sm:$0xf] %v279_v24  ;;  %v309_v39 = vld [vmem:[%s1600_s6 + $0xc8] sm:$0xf]  ;;  %v311_v40 = vld [vmem:[%s1600_s6 + $0xd0] sm:$0xf] }
  0x2f   : > { %282 = vst [vmem:[%s1605_s7 + $0x2c] sm:$0xf] %v281_v25  ;;  %v313_v41 = vld [vmem:[%s1600_s6 + $0xd8] sm:$0xf]  ;;  %v315_v42 = vld [vmem:[%s1600_s6 + $0xe0] sm:$0xf] }
  0x30   : > { %284 = vst [vmem:[%s1605_s7 + $0x30] sm:$0xf] %v283_v26  ;;  %v317_v43 = vld [vmem:[%s1600_s6 + $0xe8] sm:$0xf]  ;;  %v319_v44 = vld [vmem:[%s1600_s6 + $0xf0] sm:$0xf] }
  0x31   : > { %286 = vst [vmem:[%s1605_s7 + $0x34] sm:$0xf] %v285_v27  ;;  %v321_v45 = vld [vmem:[%s1600_s6 + $0xf8] sm:$0xf]  ;;  %v323_v46 = vld [vmem:[%s1600_s6 + $0x100] sm:$0xf] }
  0x32   : > { %288 = vst [vmem:[%s1605_s7 + $0x38] sm:$0xf] %v287_v28  ;;  %v325_v47 = vld [vmem:[%s1600_s6 + $0x108] sm:$0xf]  ;;  %v327_v48 = vld [vmem:[%s1600_s6 + $0x110] sm:$0xf] }
  0x33   : > { %290 = vst [vmem:[%s1605_s7 + $0x3c] sm:$0xf] %v289_v29  ;;  %v329_v49 = vld [vmem:[%s1600_s6 + $0x118] sm:$0xf]  ;;  %v331_v50 = vld [vmem:[%s1600_s6 + $0x120] sm:$0xf] }
  0x34   : > { %292 = vst [vmem:[%s1605_s7 + $0x40] sm:$0xf] %v291_v30  ;;  %v333_v51 = vld [vmem:[%s1600_s6 + $0x128] sm:$0xf]  ;;  %v335_v52 = vld [vmem:[%s1600_s6 + $0x130] sm:$0xf] }
  0x35   : > { %294 = vst [vmem:[%s1605_s7 + $0x44] sm:$0xf] %v293_v31  ;;  %v337_v53 = vld [vmem:[%s1600_s6 + $0x138] sm:$0xf]  ;;  %v339_v54 = vld [vmem:[%s1600_s6 + $0x140] sm:$0xf] }
  0x36   : > { %296 = vst [vmem:[%s1605_s7 + $0x48] sm:$0xf] %v295_v32  ;;  %v341_v55 = vld [vmem:[%s1600_s6 + $0x148] sm:$0xf]  ;;  %v343_v56 = vld [vmem:[%s1600_s6 + $0x150] sm:$0xf] }
  0x37   : > { %298 = vst [vmem:[%s1605_s7 + $0x4c] sm:$0xf] %v297_v33  ;;  %v345_v57 = vld [vmem:[%s1600_s6 + $0x158] sm:$0xf]  ;;  %v347_v58 = vld [vmem:[%s1600_s6 + $0x160] sm:$0xf] }
  0x38   : > { %300 = vst [vmem:[%s1605_s7 + $0x50] sm:$0xf] %v299_v34  ;;  %v349_v59 = vld [vmem:[%s1600_s6 + $0x168] sm:$0xf]  ;;  %v351_v60 = vld [vmem:[%s1600_s6 + $0x170] sm:$0xf] }
  0x39   : > { %302 = vst [vmem:[%s1605_s7 + $0x54] sm:$0xf] %v301_v35  ;;  %v353_v61 = vld [vmem:[%s1600_s6 + $0x178] sm:$0xf]  ;;  %v355_v62 = vld [vmem:[%s1600_s6 + $0x180] sm:$0xf] }
  0x3a   : > { %304 = vst [vmem:[%s1605_s7 + $0x58] sm:$0xf] %v303_v36  ;;  %v357_v63 = vld [vmem:[%s1600_s6 + $0x188] sm:$0xf]  ;;  %v359_v0 = vld [vmem:[%s1600_s6 + $0x190] sm:$0xf] }
  0x3b   : > { %306 = vst [vmem:[%s1605_s7 + $0x5c] sm:$0xf] %v305_v37  ;;  %v361_v1 = vld [vmem:[%s1600_s6 + $0x198] sm:$0xf]  ;;  %v363_v2 = vld [vmem:[%s1600_s6 + $0x1a0] sm:$0xf] }
  0x3c   : > { %308 = vst [vmem:[%s1605_s7 + $0x60] sm:$0xf] %v307_v38  ;;  %v365_v3 = vld [vmem:[%s1600_s6 + $0x1a8] sm:$0xf]  ;;  %v367_v4 = vld [vmem:[%s1600_s6 + $0x1b0] sm:$0xf] }
  0x3d   : > { %310 = vst [vmem:[%s1605_s7 + $0x64] sm:$0xf] %v309_v39  ;;  %v369_v5 = vld [vmem:[%s1600_s6 + $0x1b8] sm:$0xf]  ;;  %v371_v6 = vld [vmem:[%s1600_s6 + $0x1c0] sm:$0xf] }
  0x3e   : > { %312 = vst [vmem:[%s1605_s7 + $0x68] sm:$0xf] %v311_v40  ;;  %v373_v7 = vld [vmem:[%s1600_s6 + $0x1c8] sm:$0xf]  ;;  %v375_v8 = vld [vmem:[%s1600_s6 + $0x1d0] sm:$0xf] }
  0x3f   : > { %314 = vst [vmem:[%s1605_s7 + $0x6c] sm:$0xf] %v313_v41  ;;  %v377_v9 = vld [vmem:[%s1600_s6 + $0x1d8] sm:$0xf]  ;;  %v379_v10 = vld [vmem:[%s1600_s6 + $0x1e0] sm:$0xf] }
  0x40   : > { %316 = vst [vmem:[%s1605_s7 + $0x70] sm:$0xf] %v315_v42  ;;  %v381_v11 = vld [vmem:[%s1600_s6 + $0x1e8] sm:$0xf]  ;;  %v383_v12 = vld [vmem:[%s1600_s6 + $0x1f0] sm:$0xf] }
  0x41   : > { %318 = vst [vmem:[%s1605_s7 + $0x74] sm:$0xf] %v317_v43  ;;  %v385_v13 = vld [vmem:[%s1600_s6 + $0x1f8] sm:$0xf]  ;;  %v387_v14 = vld [vmem:[%s1600_s6 + $0x200] sm:$0xf] }
  0x42   : > { %320 = vst [vmem:[%s1605_s7 + $0x78] sm:$0xf] %v319_v44  ;;  %v389_v15 = vld [vmem:[%s1600_s6 + $0x208] sm:$0xf]  ;;  %v391_v16 = vld [vmem:[%s1600_s6 + $0x210] sm:$0xf] }
  0x43   : > { %322 = vst [vmem:[%s1605_s7 + $0x7c] sm:$0xf] %v321_v45  ;;  %v393_v17 = vld [vmem:[%s1600_s6 + $0x218] sm:$0xf]  ;;  %v395_v18 = vld [vmem:[%s1600_s6 + $0x220] sm:$0xf] }
  0x44   : > { %324 = vst [vmem:[%s1605_s7 + $0x80] sm:$0xf] %v323_v46  ;;  %v397_v19 = vld [vmem:[%s1600_s6 + $0x228] sm:$0xf] }
  0x45   : > { %326 = vst [vmem:[%s1605_s7 + $0x84] sm:$0xf] %v325_v47 }
  0x46   : > { %328 = vst [vmem:[%s1605_s7 + $0x88] sm:$0xf] %v327_v48 }
  0x47   : > { %330 = vst [vmem:[%s1605_s7 + $0x8c] sm:$0xf] %v329_v49 }
  0x48   : > { %332 = vst [vmem:[%s1605_s7 + $0x90] sm:$0xf] %v331_v50 }
  0x49   : > { %334 = vst [vmem:[%s1605_s7 + $0x94] sm:$0xf] %v333_v51 }
  0x4a   : > { %336 = vst [vmem:[%s1605_s7 + $0x98] sm:$0xf] %v335_v52 }
  0x4b   : > { %338 = vst [vmem:[%s1605_s7 + $0x9c] sm:$0xf] %v337_v53 }
  0x4c   : > { %340 = vst [vmem:[%s1605_s7 + $0xa0] sm:$0xf] %v339_v54 }
  0x4d   : > { %342 = vst [vmem:[%s1605_s7 + $0xa4] sm:$0xf] %v341_v55 }
  0x4e   : > { %344 = vst [vmem:[%s1605_s7 + $0xa8] sm:$0xf] %v343_v56 }
  0x4f   : > { %346 = vst [vmem:[%s1605_s7 + $0xac] sm:$0xf] %v345_v57 }
  0x50   : > { %348 = vst [vmem:[%s1605_s7 + $0xb0] sm:$0xf] %v347_v58 }
  0x51   : > { %350 = vst [vmem:[%s1605_s7 + $0xb4] sm:$0xf] %v349_v59 }
  0x52   : > { %352 = vst [vmem:[%s1605_s7 + $0xb8] sm:$0xf] %v351_v60 }
  0x53   : > { %354 = vst [vmem:[%s1605_s7 + $0xbc] sm:$0xf] %v353_v61 }
  0x54   : > { %356 = vst [vmem:[%s1605_s7 + $0xc0] sm:$0xf] %v355_v62 }
  0x55   : > { %358 = vst [vmem:[%s1605_s7 + $0xc4] sm:$0xf] %v357_v63 }
  0x56   : > { %360 = vst [vmem:[%s1605_s7 + $0xc8] sm:$0xf] %v359_v0 }
  0x57   : > { %362 = vst [vmem:[%s1605_s7 + $0xcc] sm:$0xf] %v361_v1 }
  0x58   : > { %364 = vst [vmem:[%s1605_s7 + $0xd0] sm:$0xf] %v363_v2 }
  0x59   : > { %366 = vst [vmem:[%s1605_s7 + $0xd4] sm:$0xf] %v365_v3 }
  0x5a   : > { %368 = vst [vmem:[%s1605_s7 + $0xd8] sm:$0xf] %v367_v4 }
  0x5b   : > { %370 = vst [vmem:[%s1605_s7 + $0xdc] sm:$0xf] %v369_v5 }
  0x5c   : > { %372 = vst [vmem:[%s1605_s7 + $0xe0] sm:$0xf] %v371_v6 }
  0x5d   : > { %374 = vst [vmem:[%s1605_s7 + $0xe4] sm:$0xf] %v373_v7 }
  0x5e   : > { %376 = vst [vmem:[%s1605_s7 + $0xe8] sm:$0xf] %v375_v8 }
  0x5f   : > { %378 = vst [vmem:[%s1605_s7 + $0xec] sm:$0xf] %v377_v9 }
  0x60   : > { %380 = vst [vmem:[%s1605_s7 + $0xf0] sm:$0xf] %v379_v10 }
  0x61   : > { %382 = vst [vmem:[%s1605_s7 + $0xf4] sm:$0xf] %v381_v11 }
  0x62   : > { %384 = vst [vmem:[%s1605_s7 + $0xf8] sm:$0xf] %v383_v12 }
  0x63   : > { %386 = vst [vmem:[%s1605_s7 + $0xfc] sm:$0xf] %v385_v13 }
  0x64   : > { %388 = vst [vmem:[%s1605_s7 + $0x100] sm:$0xf] %v387_v14 }
  0x65   : > { %390 = vst [vmem:[%s1605_s7 + $0x104] sm:$0xf] %v389_v15 }
  0x66   : > { %392 = vst [vmem:[%s1605_s7 + $0x108] sm:$0xf] %v391_v16 }
  0x67   : > { %394 = vst [vmem:[%s1605_s7 + $0x10c] sm:$0xf] %v393_v17 }
  0x68   : > { %396 = vst [vmem:[%s1605_s7 + $0x110] sm:$0xf] %v395_v18 }
  0x69   : > { %398 = vst [vmem:[%s1605_s7 + $0x114] sm:$0xf] %v397_v19 }
  0x6a PF: > { %p1474_p5 = scmp.ge.s32.totalorder %s1530_s14, 1  ;;  %p568_p6 = scmp.lt.s32.totalorder %s1530_s14, 3 }
  0x6c   : > { %p569_p7 = pnand %p1474_p5, %p568_p6 }
  0x6e   : > { %572 = sbr.rel (%p569_p7) target bundleno = 327 (0x147), region = 106 }
  0x73   : > { %s575_s8 = sand.u32 1, %s1522_s12   ;;  %vm872_vm0 = vcmask 1042432   ;;  %vm957_vm1 = vcmask 1040384   ;;  %p612_p8 = scmp.lt.s32.totalorder %s1468_s15, 1 }
  0x74   : > { %s1481_s9 = smul.u32 56, %s575_s8 }
  0x75   : > { %s1482_s11 = smul.u32 280, %s575_s8  ;;  %s2941_s15 = smov (!%p612_p8, %s1468_s15), 1 }
  0x76   : > { %s577_s10 = scalar_lea.vmem [#allocation2], %s1481_s9  ;;  %s1475_s17 = sshll.u32 %s2941_s15, 3 }
  0x77   : > { %v621_v20 = vld [vmem:[%s577_s10 + $0x4] sm:$0x3]  ;;  %v1747_v22 = vld [vmem:[%s577_s10] sm:$0xf]  ;;  %v1749_v23 = vld [vmem:[%s577_s10 + $0x8] sm:$0xf]  ;;  %s615_s21 = scalar_lea.vmem %s2743_s2, %s1475_s17  ;;  %s619_s15 = scalar_lea.vmem %s2744_s3, %s1475_s17 }
  0x78   : > { %v635_v21 = vunpack.c.l.bf16 %v621_v20  ;;  %2778 = vst [vmem:[#allocation4_spill] sm:$0xff] %v1747_v22  ;;  %v1751_v24 = vld [vmem:[%s577_s10 + $0xc] sm:$0x3]  ;;  %v1753_v25 = vld [vmem:[%s577_s10 + $0x10] sm:$0xf]  ;;  %s1776_s12 = scalar_lea.vmem [#allocation3], %s1482_s11  ;;  %v2745_v40 = vunpack.c.l.bf16 %v1747_v22 }
  0x79   : > { %v1755_v26 = vld [vmem:[%s577_s10 + $0x14] sm:$0x3]  ;;  %v1757_v27 = vld [vmem:[%s577_s10 + $0x18] sm:$0xf]  ;;  %v1759_v28 = vld [vmem:[%s577_s10 + $0x1c] sm:$0x3] }
  0x7a   : > { %v1761_v29 = vld [vmem:[%s577_s10 + $0x20] sm:$0xf]  ;;  %v1764_v30 = vsel %vm872_vm0, %v635_v21, 0.0  ;;  %v1766_v31 = vld [vmem:[%s577_s10 + $0x24] sm:$0x3] }
  0x7b   : > { %2779 = vst [vmem:[#allocation5_spill] sm:$0xff] %v1764_v30  ;;  %v1768_v32 = vld [vmem:[%s577_s10 + $0x28] sm:$0xf]  ;;  %v1770_v33 = vld [vmem:[%s577_s10 + $0x2c] sm:$0x3]  ;;  %v1829_v60 = vadd.f32 %v1764_v30, %v2745_v40 }
  0x7c   : > { %v1772_v34 = vld [vmem:[%s577_s10 + $0x30] sm:$0xf]  ;;  %v1774_v35 = vld [vmem:[%s577_s10 + $0x34] sm:$0x3]  ;;  %v1785_v38 = vld [vmem:[%s1776_s12 + $0x8] sm:$0xf] }
  0x7d   : > { %v1779_v36 = vld [vmem:[%s1776_s12] sm:$0xf]  ;;  %v1782_v37 = vld [vmem:[%s1776_s12 + $0x4] sm:$0x3]  ;;  %v1788_v39 = vld [vmem:[%s1776_s12 + $0xc] sm:$0x3]  ;;  %v720_v7 = vunpack.c.l.bf16 %v1785_v38 }
  0x7e   : > { %v1795_v44 = vld [vmem:[%s1776_s12 + $0x10] sm:$0xf]  ;;  %v1798_v45 = vld [vmem:[%s1776_s12 + $0x14] sm:$0x3]  ;;  %v1801_v46 = vld [vmem:[%s1776_s12 + $0x18] sm:$0xf]  ;;  %v718_v2 = vunpack.c.l.bf16 %v1779_v36  ;;  %v719_v3 = vunpack.c.l.bf16 %v1782_v37  ;;  %v721_v8 = vunpack.c.l.bf16 %v1788_v39 }
  0x7f   : > { %v1808_v51 = vld [vmem:[%s1776_s12 + $0x1c] sm:$0x3]  ;;  %v1811_v52 = vld [vmem:[%s1776_s12 + $0x20] sm:$0xf]  ;;  %v1814_v53 = vld [vmem:[%s1776_s12 + $0x24] sm:$0x3]  ;;  %v2788_v14 = vunpack.c.l.bf16 %v1795_v44  ;;  %v2791_v15 = vunpack.c.l.bf16 %v1798_v45  ;;  %v2795_v9 = vunpack.c.l.bf16 %v1801_v46 }
  0x80   : > { %v1820_v57 = vld [vmem:[%s1776_s12 + $0x28] sm:$0xf]  ;;  %v1823_v58 = vld [vmem:[%s1776_s12 + $0x2c] sm:$0x3]  ;;  %v662_v59 = vld [vmem:[%s1776_s12 + $0x38] sm:$0xf]  ;;  %v2798_v10 = vunpack.c.l.bf16 %v1808_v51  ;;  %v2801_v22 = vunpack.c.l.bf16 %v1811_v52 }
  0x81   : > { %v1834_v63 = vld [vmem:[%s1776_s12 + $0x30] sm:$0xf]  ;;  %v1837_v0 = vld [vmem:[%s1776_s12 + $0x34] sm:$0x3]  ;;  %v663_v1 = vld [vmem:[%s1776_s12 + $0x3c] sm:$0x3]  ;;  %v732_v17 = vunpack.c.l.bf16 %v662_v59 }
  0x82   : > { %v664_v4 = vld [vmem:[%s1776_s12 + $0x40] sm:$0xf]  ;;  %v665_v5 = vld [vmem:[%s1776_s12 + $0x44] sm:$0x3]  ;;  %v1845_v6 = vld [vmem:[%s1776_s12 + $0x48] sm:$0xf]  ;;  %v733_v38 = vunpack.c.l.bf16 %v663_v1 }
  0x83   : > { %v1852_v11 = vld [vmem:[%s1776_s12 + $0x4c] sm:$0x3]  ;;  %v1855_v12 = vld [vmem:[%s1776_s12 + $0x50] sm:$0xf]  ;;  %v1858_v13 = vld [vmem:[%s1776_s12 + $0x54] sm:$0x3]  ;;  %v734_v62 = vunpack.c.l.bf16 %v664_v4  ;;  %v735_v56 = vunpack.c.l.bf16 %v665_v5  ;;  %v736_v43 = vunpack.c.l.bf16 %v1845_v6 }
  0x84   : > { %v1864_v18 = vld [vmem:[%s1776_s12 + $0x58] sm:$0xf]  ;;  %v1867_v19 = vld [vmem:[%s1776_s12 + $0x5c] sm:$0x3]  ;;  %v1870_v20 = vld [vmem:[%s1776_s12 + $0x60] sm:$0xf]  ;;  %v737_v41 = vunpack.c.l.bf16 %v1852_v11  ;;  %v738_v54 = vunpack.c.l.bf16 %v1855_v12  ;;  %v739_v49 = vunpack.c.l.bf16 %v1858_v13  ;;  %v1911_v11 = vadd.f32 %v732_v17, %v718_v2 }
  0x85   : > { %v1876_v39 = vld [vmem:[%s1776_s12 + $0x64] sm:$0x3]  ;;  %v1879_v59 = vld [vmem:[%s1776_s12 + $0x68] sm:$0xf]  ;;  %v1882_v40 = vld [vmem:[%s1776_s12 + $0x6c] sm:$0x3]  ;;  %v740_v42 = vunpack.c.l.bf16 %v1864_v18  ;;  %v1925_v55 = vadd.f32 %v733_v38, %v719_v3  ;;  %v1939_v36 = vadd.f32 %v734_v62, %v720_v7  ;;  %v1953_v16 = vadd.f32 %v735_v56, %v721_v8 }
  0x86   : > { %v1887_v50 = vld [vmem:[%s1776_s12 + $0x70] sm:$0xf]  ;;  %v1890_v1 = vld [vmem:[%s1776_s12 + $0x74] sm:$0x3]  ;;  %v1893_v48 = vld [vmem:[%s1776_s12 + $0x78] sm:$0xf]  ;;  %v1969_v21 = vadd.f32 %v736_v43, %v2788_v14  ;;  %v1985_v44 = vadd.f32 %v737_v41, %v2791_v15  ;;  %v2001_v45 = vadd.f32 %v738_v54, %v2795_v9  ;;  %v2017_v46 = vadd.f32 %v739_v49, %v2798_v10 }
  0x87   : > { %v1900_v4 = vld [vmem:[%s1776_s12 + $0x7c] sm:$0x3]  ;;  %v1903_v5 = vld [vmem:[%s1776_s12 + $0x80] sm:$0xf]  ;;  %v1906_v47 = vld [vmem:[%s1776_s12 + $0x84] sm:$0x3]  ;;  %v2033_v51 = vadd.f32 %v740_v42, %v2801_v22  ;;  %v2804_v52 = vunpack.c.l.bf16 %v1867_v19  ;;  %v2809_v19 = vunpack.c.l.bf16 %v1870_v20 }
  0x88   : > { %v1914_v12 = vld [vmem:[%s1776_s12 + $0x88] sm:$0xf]  ;;  %v1917_v13 = vld [vmem:[%s1776_s12 + $0x8c] sm:$0x3]  ;;  %v1920_v61 = vld [vmem:[%s1776_s12 + $0x90] sm:$0xf] }
  0x89   : > { %2780 = vst [vmem:[#allocation6_spill] sm:$0xff] %v1917_v13  ;;  %v1928_v2 = vld [vmem:[%s1776_s12 + $0x94] sm:$0x3]  ;;  %v1931_v17 = vld [vmem:[%s1776_s12 + $0x98] sm:$0xf]  ;;  %v2803_v13 = vunpack.c.l.bf16 %v1814_v53  ;;  %v2808_v53 = vunpack.c.l.bf16 %v1820_v57  ;;  %v2814_v57 = vunpack.c.l.bf16 %v1876_v39 }
  0x8a   : > { %2781 = vst [vmem:[#allocation7_spill] sm:$0xff] %v1920_v61  ;;  %v1934_v6 = vld [vmem:[%s1776_s12 + $0x9c] sm:$0x3]  ;;  %v1942_v3 = vld [vmem:[%s1776_s12 + $0xa0] sm:$0xf] }
  0x8b   : > { %2782 = vst [vmem:[#allocation8_spill] sm:$0xff] %v1931_v17  ;;  %v1945_v38 = vld [vmem:[%s1776_s12 + $0xa4] sm:$0x3]  ;;  %v1948_v18 = vld [vmem:[%s1776_s12 + $0xa8] sm:$0xf]  ;;  %v2051_v22 = vadd.f32 %v2804_v52, %v2803_v13  ;;  %v2069_v13 = vadd.f32 %v2809_v19, %v2808_v53  ;;  %v2813_v17 = vunpack.c.l.bf16 %v1823_v58  ;;  %v2819_v58 = vunpack.c.l.bf16 %v1879_v59 }
  0x8c   : > { %2783 = vst [vmem:[#allocation9_spill] sm:$0xff] %v1934_v6  ;;  %v1956_v62 = vld [vmem:[%s1776_s12 + $0xac] sm:$0x3]  ;;  %v1959_v7 = vld [vmem:[%s1776_s12 + $0xb0] sm:$0xf] }
  0x8d   : > { %2784 = vst [vmem:[#allocation10_spill] sm:$0xff] %v1945_v38  ;;  %v1962_v37 = vld [vmem:[%s1776_s12 + $0xb4] sm:$0x3]  ;;  %v1972_v56 = vld [vmem:[%s1776_s12 + $0xb8] sm:$0xf]  ;;  %v2818_v38 = vunpack.c.l.bf16 %v1834_v63 }
  0x8e   : > { %2785 = vst [vmem:[#allocation11_spill] sm:$0xff] %v1948_v18  ;;  %v1975_v8 = vld [vmem:[%s1776_s12 + $0xbc] sm:$0x3]  ;;  %v1978_v30 = vld [vmem:[%s1776_s12 + $0xc0] sm:$0xf] }
  0x8f   : > { %2786 = vst [vmem:[#allocation12_spill] sm:$0xff] %v1959_v7  ;;  %v1988_v43 = vld [vmem:[%s1776_s12 + $0xc4] sm:$0x3]  ;;  %v1991_v14 = vld [vmem:[%s1776_s12 + $0xc8] sm:$0xf] }
  0x90   : > { %2787 = vst [vmem:[#allocation13_spill] sm:$0xff] %v1962_v37  ;;  %v1994_v61 = vld [vmem:[%s1776_s12 + $0xcc] sm:$0x3]  ;;  %v2004_v41 = vld [vmem:[%s1776_s12 + $0xd0] sm:$0xf] }
  0x91   : > { %2789 = vst [vmem:[#allocation14_spill] sm:$0xff] %v1975_v8  ;;  %v2007_v15 = vld [vmem:[%s1776_s12 + $0xd4] sm:$0x3]  ;;  %v2010_v6 = vld [vmem:[%s1776_s12 + $0xd8] sm:$0xf] }
  0x92   : > { %2790 = vst [vmem:[#allocation15_spill] sm:$0xff] %v1978_v30  ;;  %v2020_v54 = vld [vmem:[%s1776_s12 + $0xdc] sm:$0x3]  ;;  %v2023_v9 = vld [vmem:[%s1776_s12 + $0xe0] sm:$0xf] }
  0x93   : > { %2792 = vst [vmem:[#allocation16_spill] sm:$0xff] %v1988_v43  ;;  %v2026_v18 = vld [vmem:[%s1776_s12 + $0xe4] sm:$0x3]  ;;  %v2036_v49 = vld [vmem:[%s1776_s12 + $0xe8] sm:$0xf] }
  0x94   : > { %2793 = vst [vmem:[#allocation17_spill] sm:$0xff] %v1991_v14  ;;  %v2039_v10 = vld [vmem:[%s1776_s12 + $0xec] sm:$0x3]  ;;  %v2042_v37 = vld [vmem:[%s1776_s12 + $0xf0] sm:$0xf] }
  0x95   : > { %2794 = vst [vmem:[#allocation18_spill] sm:$0xff] %v1994_v61  ;;  %v2054_v42 = vld [vmem:[%s1776_s12 + $0xf4] sm:$0x3]  ;;  %v2057_v30 = vld [vmem:[%s1776_s12 + $0xf8] sm:$0xf] }
  0x96   : > { %2796 = vst [vmem:[#allocation19_spill] sm:$0xff] %v2007_v15  ;;  %v2060_v8 = vld [vmem:[%s1776_s12 + $0xfc] sm:$0x3]  ;;  %v2072_v52 = vld [vmem:[%s1776_s12 + $0x100] sm:$0xf]  ;;  %v2821_v15 = vunpack.c.l.bf16 %v1882_v40  ;;  %v2823_v40 = vunpack.c.l.bf16 %v1890_v1  ;;  %v875_v1 = vrot.slane %v1829_v60, 4 }
  0x97   : > { %2797 = vst [vmem:[#allocation20_spill] sm:$0xff] %v2010_v6  ;;  %v2075_v61 = vld [vmem:[%s1776_s12 + $0x104] sm:$0x3]  ;;  %v2078_v14 = vld [vmem:[%s1776_s12 + $0x108] sm:$0xf]  ;;  %v2087_v6 = vadd.f32 %v2814_v57, %v2813_v17 }
  0x98   : > { %2799 = vst [vmem:[#allocation21_spill] sm:$0xff] %v2023_v9  ;;  %v2090_v20 = vld [vmem:[%s1776_s12 + $0x10c] sm:$0x3]  ;;  %v2093_v53 = vld [vmem:[%s1776_s12 + $0x110] sm:$0xf]  ;;  %v2820_v9 = vunpack.c.l.bf16 %v1837_v0 }
  0x99   : > { %2800 = vst [vmem:[#allocation22_spill] sm:$0xff] %v2026_v18  ;;  %v2096_v19 = vld [vmem:[%s1776_s12 + $0x114] sm:$0x3]  ;;  %v2105_v18 = vadd.f32 %v2819_v58, %v2818_v38  ;;  %v2822_v38 = vunpack.c.l.bf16 %v1887_v50  ;;  %v2825_v50 = vunpack.c.l.bf16 %v1900_v4 }
  0x9a   : > { %2802 = vst [vmem:[#allocation23_spill] sm:$0xff] %v2036_v49  ;;  %v2114_v49 = vadd.f32 %v2821_v15, %v2820_v9  ;;  %v2130_v15 = vadd.f32 %v1925_v55, %v2823_v40  ;;  %v2824_v9 = vunpack.c.l.bf16 %v1893_v48  ;;  %v2827_v55 = vunpack.c.l.bf16 %v1751_v24 }
  0x9b   : > { %2805 = vst [vmem:[#allocation24_spill] sm:$0xff] %v2054_v42  ;;  %v2122_v58 = vadd.f32 %v1911_v11, %v2822_v38  ;;  %v2140_v11 = vadd.f32 %v1953_v16, %v2825_v50  ;;  %v2826_v38 = vunpack.c.l.bf16 %v1903_v5  ;;  %v2828_v48 = vunpack.c.l.bf16 %v1755_v26 }
  0x9c   : > { %2806 = vst [vmem:[#allocation25_spill] sm:$0xff] %v2057_v30  ;;  %v2135_v59 = vadd.f32 %v1939_v36, %v2824_v9  ;;  %v2151_v40 = vsel %vm872_vm0, %v2827_v55, 0.0  ;;  %v2829_v16 = vunpack.c.l.bf16 %v1759_v28  ;;  %v876_v24 = vadd.f32 %v875_v1, %v1829_v60 }
  0x9d   : > { %2807 = vst [vmem:[#allocation26_spill] sm:$0xff] %v2060_v8  ;;  %v2145_v57 = vadd.f32 %v1969_v21, %v2826_v38  ;;  %v2156_v36 = vsel %vm872_vm0, %v2828_v48, 0.0  ;;  %v2830_v21 = vunpack.c.l.bf16 %v1766_v31  ;;  %v2831_v9 = vunpack.c.l.bf16 %v1749_v23 }
  0x9e   : > { %2810 = vst [vmem:[#allocation27_spill] sm:$0xff] %v2072_v52  ;;  %v2161_v4 = vsel %vm872_vm0, %v2829_v16, 0.0  ;;  %v2832_v26 = vunpack.c.l.bf16 %v1753_v25  ;;  %v2833_v28 = vunpack.c.l.bf16 %v1757_v27  ;;  %v2834_v48 = vunpack.c.l.bf16 %v1906_v47 }
  0x9f   : > { %2811 = vst [vmem:[#allocation28_spill] sm:$0xff] %v2075_v61  ;;  %v2166_v5 = vsel %vm872_vm0, %v2830_v21, 0.0  ;;  %v882_v50 = vadd.f32 %v2151_v40, %v2831_v9  ;;  %v2835_v16 = vunpack.c.l.bf16 %v1761_v29  ;;  %v2836_v1 = vunpack.c.l.bf16 %v1770_v33 }
  0xa0   : > { %2812 = vst [vmem:[#allocation29_spill] sm:$0xff] %v2078_v14  ;;  %v890_v38 = vadd.f32 %v2156_v36, %v2832_v26  ;;  %v898_v55 = vadd.f32 %v2161_v4, %v2833_v28  ;;  %v2181_v31 = vadd.f32 %v1985_v44, %v2834_v48  ;;  %v2837_v9 = vunpack.c.l.bf16 %v1774_v35 }
  0xa1   : > { %2815 = vst [vmem:[#allocation30_spill] sm:$0xff] %v2090_v20  ;;  %v906_v60 = vadd.f32 %v2166_v5, %v2835_v16  ;;  %v2189_v21 = vsel %vm872_vm0, %v2836_v1, 0.0  ;;  %v877_v28 = vrot.slane %v876_v24, 2  ;;  %v883_v0 = vrot.slane %v882_v50, 4 }
  0xa2   : > { %2816 = vst [vmem:[#allocation31_spill] sm:$0xff] %v2093_v53  ;;  %v2194_v26 = vsel %vm872_vm0, %v2837_v9, 0.0  ;;  %v891_v47 = vrot.slane %v890_v38, 4  ;;  %v899_v17 = vrot.slane %v898_v55, 4  ;;  %v2838_v44 = vunpack.c.l.bf16 %v1914_v12 }
  0xa3   : > { %2817 = vst [vmem:[#allocation32_spill] sm:$0xff] %v2096_v19  ;;  %v907_v63 = vrot.slane %v906_v60, 4  ;;  %v2839_v16 = vunpack.c.l.bf16 %v1768_v32  ;;  %v2840_v1 = vunpack.c.l.bf16 %v1772_v34  ;;  %v878_v7 = vadd.f32 %v877_v28, %v876_v24  ;;  %v2841_v19 = vld [vmem:[#allocation6_spill] sm:$0xff] }
  0xa4   : > { %v808_v48 = vadd.f32 %v2001_v45, %v2838_v44  ;;  %v884_v9 = vadd.f32 %v883_v0, %v882_v50  ;;  %v892_v39 = vadd.f32 %v891_v47, %v890_v38  ;;  %v900_v43 = vadd.f32 %v899_v17, %v898_v55  ;;  %v2846_v50 = vld [vmem:[#allocation8_spill] sm:$0xff] }
  0xa5   : > { %v914_v33 = vadd.f32 %v2189_v21, %v2839_v16  ;;  %v922_v35 = vadd.f32 %v2194_v26, %v2840_v1  ;;  %v2842_v53 = vunpack.c.l.bf16 %v2841_v19  ;;  %v908_v12 = vadd.f32 %v907_v63, %v906_v60  ;;  %v2843_v16 = vld [vmem:[#allocation7_spill] sm:$0xff] }
  0xa6   : > { %v879_v44 = vrot.slane %v878_v7, 1  ;;  %v885_v61 = vrot.slane %v884_v9, 2  ;;  %v893_v52 = vrot.slane %v892_v39, 2  ;;  %v901_v8 = vrot.slane %v900_v43, 2 }
  0xa7   : > { %v809_v20 = vadd.f32 %v2017_v46, %v2842_v53  ;;  %v915_v14 = vrot.slane %v914_v33, 4  ;;  %v923_v45 = vrot.slane %v922_v35, 4  ;;  %v2844_v30 = vunpack.c.l.bf16 %v2843_v16 }
  0xa8   : > { %v909_v1 = vrot.slane %v908_v12, 2  ;;  %v2845_v17 = vunpack.c.l.bf16 %v1928_v2  ;;  %v886_v46 = vadd.f32 %v885_v61, %v884_v9  ;;  %v894_v53 = vadd.f32 %v893_v52, %v892_v39  ;;  %v2851_v39 = vld [vmem:[#allocation10_spill] sm:$0xff] }
  0xa9   : > { %v810_v42 = vadd.f32 %v2033_v51, %v2844_v30  ;;  %v916_v24 = vadd.f32 %v915_v14, %v914_v33  ;;  %v924_v0 = vadd.f32 %v923_v45, %v922_v35  ;;  %v902_v63 = vadd.f32 %v901_v8, %v900_v43  ;;  %v2848_v30 = vld [vmem:[#allocation9_spill] sm:$0xff]  ;;  %v2853_v45 = vld [vmem:[#allocation11_spill] sm:$0xff] }
  0xaa   : > { %v2214_v19 = vadd.f32 %v2051_v22, %v2845_v17  ;;  %v2847_v38 = vunpack.c.l.bf16 %v2846_v50  ;;  %v910_v60 = vadd.f32 %v909_v1, %v908_v12  ;;  %v2849_v51 = vunpack.c.l.bf16 %v2848_v30  ;;  %v2856_v50 = vld [vmem:[#allocation4_spill] sm:$0xff] }
  0xab   : > { %v917_v28 = vrot.slane %v916_v24, 2  ;;  %v925_v47 = vrot.slane %v924_v0, 2  ;;  %v880_v2 = vadd.f32 %v879_v44, %v878_v7  ;;  %v887_v33 = vrot.slane %v886_v46, 1 }
  0xac   : > { %v2219_v55 = vadd.f32 %v2069_v13, %v2847_v38  ;;  %v2224_v14 = vadd.f32 %v2087_v6, %v2849_v51  ;;  %v895_v22 = vrot.slane %v894_v53, 1  ;;  %v903_v35 = vrot.slane %v902_v63, 1  ;;  %v2860_v51 = vld [vmem:[#allocation12_spill] sm:$0xff] }
  0xad   : > { %v911_v61 = vrot.slane %v910_v60, 1  ;;  %v918_v52 = vadd.f32 %v917_v28, %v916_v24  ;;  %v926_v8 = vadd.f32 %v925_v47, %v924_v0  ;;  %v2850_v43 = vunpack.c.l.bf16 %v1942_v3  ;;  %v2859_v47 = vld [vmem:[#allocation5_spill] sm:$0xff] }
  0xae   : > { %v2852_v9 = vunpack.c.l.bf16 %v2851_v39  ;;  %v2854_v6 = vunpack.c.l.bf16 %v2853_v45  ;;  %v888_v44 = vadd.f32 %v887_v33, %v886_v46  ;;  %v896_v16 = vadd.f32 %v895_v22, %v894_v53  ;;  %v2868_v45 = vld [vmem:[#allocation15_spill] sm:$0xff] }
  0xaf   : > { %v2229_v13 = vadd.f32 %v2105_v18, %v2850_v43  ;;  %v912_v1 = vadd.f32 %v911_v61, %v910_v60  ;;  %v919_v24 = vrot.slane %v918_v52, 1  ;;  %v927_v0 = vrot.slane %v926_v8, 1 }
  0xb0   : > { %v2234_v12 = vadd.f32 %v2114_v49, %v2852_v9  ;;  %v2239_v7 = vadd.f32 %v2122_v58, %v2854_v6  ;;  %v2855_v3 = vunpack.c.l.bf16 %v1956_v62  ;;  %v929_v17 = vlaneseq }
  0xb1   : > { %v2857_v38 = vunpack.c.l.bf16 %v2856_v50  ;;  %v2858_v49 = vunpack.c.l.bf16 %v1749_v23  ;;  %v983_v58 = vadd.f32 %v2151_v40, %v2859_v47  ;;  %v904_v30 = vadd.f32 %v903_v35, %v902_v63  ;;  %v2866_v35 = vld [vmem:[#allocation14_spill] sm:$0xff]  ;;  %v2873_v50 = vld [vmem:[#allocation17_spill] sm:$0xff] }
  0xb2   : > { %v2244_v18 = vadd.f32 %v2130_v15, %v2855_v3  ;;  %v920_v46 = vadd.f32 %v919_v24, %v918_v52  ;;  %v928_v53 = vadd.f32 %v927_v0, %v926_v8  ;;  %v931_v60 = vmax.f32 %v880_v2, %v912_v1  ;;  %v2862_v15 = vld [vmem:[#allocation13_spill] sm:$0xff] }
  0xb3   : > { %v977_v28 = vadd.f32 %v2858_v49, %v2857_v38  ;;  %v2861_v33 = vunpack.c.l.bf16 %v2860_v51  ;;  %v2863_v22 = vunpack.c.l.bf16 %v2862_v15  ;;  %v2864_v23 = vunpack.c.l.bf16 %v1753_v25 }
  0xb4   : > { %v984_v39 = vadd.f32 %v983_v58, %v2156_v36  ;;  %v2865_v40 = vunpack.c.l.bf16 %v1972_v56  ;;  %v2867_v52 = vunpack.c.l.bf16 %v2866_v35  ;;  %v932_v8 = vmax.f32 %v888_v44, %v920_v46 }
  0xb5   : > { %v2255_v62 = vadd.f32 %v2135_v59, %v2861_v33  ;;  %v2260_v61 = vadd.f32 %v2140_v11, %v2863_v22  ;;  %v978_v43 = vadd.f32 %v977_v28, %v2864_v23  ;;  %v933_v9 = vmax.f32 %v896_v16, %v928_v53 }
  0xb6   : > { %v2268_v63 = vadd.f32 %v2145_v57, %v2865_v40  ;;  %v2273_v59 = vadd.f32 %v2181_v31, %v2867_v52  ;;  %v2869_v11 = vunpack.c.l.bf16 %v2868_v45  ;;  %v2279_v25 = vshrl.u32 %v929_v17, 7  ;;  %v2871_v57 = vld [vmem:[#allocation16_spill] sm:$0xff] }
  0xb7   : > { %v2870_v36 = vunpack.c.l.bf16 %v1757_v27  ;;  %v985_v56 = vadd.f32 %v984_v39, %v2161_v4  ;;  %v2872_v0 = vunpack.c.l.bf16 %v2871_v57  ;;  %v2874_v31 = vunpack.c.l.bf16 %v2873_v50 }
  0xb8   : > { %v2277_v6 = vadd.f32 %v808_v48, %v2869_v11  ;;  %v934_v49 = vmax.f32 %v931_v60, %v932_v8  ;;  %v935_v28 = vmax.f32 %v933_v9, %v904_v30  ;;  %v944_v48 = vrot.slane %v2279_v25, 1  ;;  %v2878_v8 = vld [vmem:[#allocation18_spill] sm:$0xff] }
  0xb9   : > { %v979_v24 = vadd.f32 %v978_v43, %v2870_v36  ;;  %v2286_v3 = vadd.f32 %v809_v20, %v2872_v0  ;;  %v2290_v38 = vadd.f32 %v810_v42, %v2874_v31  ;;  %v945_v17 = vrot.slane %v2279_v25, 2  ;;  %v2881_v0 = vld [vmem:[#allocation19_spill] sm:$0xff]  ;;  %v2883_v31 = vld [vmem:[#allocation20_spill] sm:$0xff] }
  0xba   : > { %v2875_v47 = vunpack.c.l.bf16 %v1761_v29  ;;  %v986_v58 = vadd.f32 %v985_v56, %v2166_v5  ;;  %v936_v4 = vmax.f32 %v934_v49, %v935_v28  ;;  %v946_v51 = vrot.slane %v2279_v25, 3 }
  0xbb   : > { %v947_v20 = vrot.slane %v2279_v25, 4  ;;  %v948_v33 = vrot.slane %v2279_v25, 5  ;;  %v949_v42 = vrot.slane %v2279_v25, 6  ;;  %v2876_v60 = vunpack.c.l.bf16 %v1768_v32 }
  0xbc   : > { %v980_v27 = vadd.f32 %v979_v24, %v2875_v47  ;;  %v987_v22 = vadd.f32 %v986_v58, %v2189_v21  ;;  %vm937_vm2 = vcmp.ge.f32.partialorder %v880_v2, %v936_v4  ;;  %vm938_vm3 = vcmp.ge.f32.partialorder %v888_v44, %v936_v4  ;;  %v2886_v47 = vld [vmem:[#allocation21_spill] sm:$0xff] }
  0xbd   : > { %vm939_vm4 = vcmp.ge.f32.partialorder %v896_v16, %v936_v4  ;;  %vm940_vm5 = vcmp.ge.f32.partialorder %v904_v30, %v936_v4  ;;  %vm941_vm6 = vcmp.ge.f32.partialorder %v912_v1, %v936_v4  ;;  %vm942_vm7 = vcmp.ge.f32.partialorder %v920_v46, %v936_v4 }
  0xbe   : > { %v981_v15 = vadd.f32 %v980_v27, %v2876_v60  ;;  %vm943_vm8 = vcmp.ge.f32.partialorder %v928_v53, %v936_v4  ;;  %v950_v29 = vsel %vm937_vm2, %v2279_v25, 7  ;;  %v951_v5 = vsel %vm938_vm3, %v944_v48, 7  ;;  %v2888_v4 = vld [vmem:[#allocation22_spill] sm:$0xff] }
  0xbf   : > { %v952_v23 = vsel %vm939_vm4, %v945_v17, 7  ;;  %v953_v43 = vsel %vm940_vm5, %v946_v51, 7  ;;  %v954_v39 = vsel %vm941_vm6, %v947_v20, 7  ;;  %v955_v40 = vsel %vm942_vm7, %v948_v33, 7  ;;  %v2890_v33 = vld [vmem:[#allocation23_spill] sm:$0xff] }
  0xc0   : > { %v956_v35 = vsel %vm943_vm8, %v949_v42, 7  ;;  %v958_v32 = vsel %vm957_vm1, %v950_v29, 2147483647  ;;  %v959_v52 = vsel %vm957_vm1, %v951_v5, 2147483647  ;;  %v2877_v16 = vunpack.c.l.bf16 %v1772_v34  ;;  %v2896_v5 = vld [vmem:[#allocation25_spill] sm:$0xff] }
  0xc1   : > { %v960_v21 = vsel %vm957_vm1, %v952_v23, 2147483647  ;;  %v961_v2 = vsel %vm957_vm1, %v953_v43, 2147483647  ;;  %v962_v44 = vsel %vm957_vm1, %v954_v39, 2147483647  ;;  %v2317_v53 = vadd.f32 %v987_v22, %v2194_v26 }
  0xc2   : > { %v2312_v1 = vadd.f32 %v981_v15, %v2877_v16  ;;  %vm963_vm9 = vcmp.lt.s32.totalorder %v958_v32, %v962_v44  ;;  %v965_v30 = vsel %vm957_vm1, %v955_v40, 2147483647  ;;  %v968_v46 = vsel %vm957_vm1, %v956_v35, 2147483647  ;;  %v2900_v40 = vld [vmem:[#allocation27_spill] sm:$0xff] }
  0xc3   : > { %v2879_v9 = vunpack.c.l.bf16 %v2878_v8  ;;  %v964_v11 = vsel %vm963_vm9, %v958_v32, %v962_v44  ;;  %vm966_vm10 = vcmp.lt.s32.totalorder %v959_v52, %v965_v30  ;;  %vm969_vm11 = vcmp.lt.s32.totalorder %v960_v21, %v968_v46  ;;  %v2902_v32 = vld [vmem:[#allocation28_spill] sm:$0xff] }
  0xc4   : > { %v2880_v36 = vunpack.c.l.bf16 %v2004_v41  ;;  %v967_v24 = vsel %vm966_vm10, %v959_v52, %v965_v30  ;;  %v970_v56 = vsel %vm969_vm11, %v960_v21, %v968_v46  ;;  %v990_v57 = vsel %vm872_vm0, %v2317_v53, -inf  ;;  %v2906_v46 = vld [vmem:[#allocation30_spill] sm:$0xff] }
  0xc5   : > { %v825_v45 = vadd.f32 %v2214_v19, %v2879_v9  ;;  %v2882_v50 = vunpack.c.l.bf16 %v2881_v0  ;;  %vm971_vm12 = vcmp.lt.s32.totalorder %v964_v11, %v967_v24  ;;  %vm973_vm13 = vcmp.lt.s32.totalorder %v970_v56, %v961_v2  ;;  %v2908_v9 = vld [vmem:[#allocation31_spill] sm:$0xff] }
  0xc6   : > { %v826_v34 = vadd.f32 %v2219_v55, %v2880_v36  ;;  %v991_v19 = vmax.f32 %v2312_v1, %v990_v57  ;;  %v2884_v49 = vunpack.c.l.bf16 %v2883_v31  ;;  %v2885_v41 = vunpack.c.l.bf16 %v2020_v54 }
  0xc7   : > { %v827_v26 = vadd.f32 %v2224_v14, %v2882_v50  ;;  %v972_v48 = vsel %vm971_vm12, %v964_v11, %v967_v24  ;;  %v974_v17 = vsel %vm973_vm13, %v970_v56, %v961_v2  ;;  %v2887_v27 = vunpack.c.l.bf16 %v2886_v47  ;;  %v2904_v2 = vld [vmem:[#allocation29_spill] sm:$0xff] }
  0xc8   : > { %v828_v28 = vadd.f32 %v2229_v13, %v2884_v49  ;;  %v829_v55 = vadd.f32 %v2234_v12, %v2885_v41  ;;  %v2889_v14 = vunpack.c.l.bf16 %v2888_v4  ;;  %vm975_vm14 = vcmp.lt.s32.totalorder %v972_v48, %v974_v17 }
  0xc9   : > { %v830_v58 = vadd.f32 %v2239_v7, %v2887_v27  ;;  %v992_v20 = vrot.slane %v991_v19, 4  ;;  %v2891_v42 = vunpack.c.l.bf16 %v2890_v33  ;;  %v2892_v54 = vunpack.c.l.bf16 %v2039_v10  ;;  %v2894_v7 = vld [vmem:[#allocation24_spill] sm:$0xff]  ;;  %v2898_v10 = vld [vmem:[#allocation26_spill] sm:$0xff] }
  0xca   : > { %v831_v51 = vadd.f32 %v2244_v18, %v2889_v14  ;;  %v2893_v60 = vunpack.c.l.bf16 %v2042_v37  ;;  %v2352_v22 = vsel %vm975_vm14, %v972_v48, %v974_v17  ;;  %v2895_v29 = vunpack.c.l.bf16 %v2894_v7 }
  0xcb   : > { %v832_v13 = vadd.f32 %v2255_v62, %v2891_v42  ;;  %v833_v12 = vadd.f32 %v2260_v61, %v2892_v54  ;;  %v2897_v23 = vunpack.c.l.bf16 %v2896_v5  ;;  %v993_v39 = vmax.f32 %v991_v19, %v992_v20 }
  0xcc   : > { %v834_v15 = vadd.f32 %v2268_v63, %v2893_v60  ;;  %v835_v18 = vadd.f32 %v2273_v59, %v2895_v29  ;;  %v2361_v62 = vadd.s32 6, %v2352_v22  ;;  %v2899_v61 = vunpack.c.l.bf16 %v2898_v10 }
  0xcd   : > { %v836_v43 = vadd.f32 %v2277_v6, %v2897_v23  ;;  %v2901_v63 = vunpack.c.l.bf16 %v2900_v40  ;;  %v2903_v52 = vunpack.c.l.bf16 %v2902_v32  ;;  %v1014_v59 = vperm.slane %v2352_v22, 0 }
  0xce   : > { %v837_v37 = vadd.f32 %v2286_v3, %v2899_v61  ;;  %v2905_v44 = vunpack.c.l.bf16 %v2904_v2  ;;  %v994_v16 = vrot.slane %v993_v39, 2  ;;  %vm1159_vm15 = vcmp.lt.s32.totalorder %v2361_v62, 0 }
  0xcf   : > { %v838_v35 = vadd.f32 %v2290_v38, %v2901_v63  ;;  %v839_v21 = vadd.f32 %v825_v45, %v2903_v52  ;;  %v1160_v30 = vsub.s32 0, %v2361_v62  ;;  %v2907_v8 = vunpack.c.l.bf16 %v2906_v46  ;;  %v2910_v38 = vld [vmem:[#allocation32_spill] sm:$0xff] }
  0xd0   : > { %v840_v6 = vadd.f32 %v826_v34, %v2905_v44  ;;  %v2909_v11 = vunpack.c.l.bf16 %v2908_v9  ;;  %v2911_v24 = vunpack.c.l.bf16 %v2910_v38  ;;  %v844_v45 = vmax.f32 %v830_v58, 0.0 }
  0xd1   : > { %v841_v3 = vadd.f32 %v827_v26, %v2907_v8  ;;  %v845_v57 = vmax.f32 %v831_v51, 0.0  ;;  %v846_v0 = vmax.f32 %v832_v13, 0.0  ;;  %v847_v50 = vmax.f32 %v833_v12, 0.0 }
  0xd2   : > { %v842_v36 = vadd.f32 %v828_v28, %v2909_v11  ;;  %v843_v56 = vadd.f32 %v829_v55, %v2911_v24  ;;  %v995_v19 = vmax.f32 %v993_v39, %v994_v16  ;;  %v848_v34 = vmax.f32 %v834_v15, 0.0 }
  0xd3   : > { %v849_v31 = vmax.f32 %v835_v18, 0.0  ;;  %vm1015_vm2 = vcmp.eq.s32.totalorder %v2279_v25, %v1014_v59  ;;  %v2386_v49 = vsel %vm1159_vm15, %v1160_v30, %v2361_v62  ;;  %v850_v26 = vmax.f32 %v836_v43, 0.0 }
  0xd4   : > { %v851_v41 = vmax.f32 %v837_v37, 0.0  ;;  %v852_v28 = vmax.f32 %v838_v35, 0.0  ;;  %v996_v48 = vrot.slane %v995_v19, 1  ;;  %v853_v17 = vmax.f32 %v839_v21, 0.0 }
  0xd5   : > { %v854_v55 = vmax.f32 %v840_v6, 0.0  ;;  %v2389_v47 = vadd.s32 8, %v2279_v25  ;;  %v855_v27 = vmax.f32 %v841_v3, 0.0  ;;  %v2775_v4 = vmov 0  }
  0xd6   : > { %v997_v58 = vmax.f32 %v995_v19, %v996_v48  ;;  %v1092_v14 = vsel %vm1015_vm2, 1, %v2775_v4  ;;  %v1162_v51 = vand.u32 65535, %v2386_v49  ;;  %v856_v20 = vmax.f32 %v842_v36, 0.0 }
  0xd7   : > { %v857_v33 = vmax.f32 %v843_v56, 0.0  ;;  %v2393_v42 = vmin.f32 %v844_v45, 1.0  ;;  %v2395_v13 = vmin.f32 %v845_v57, 1.0  ;;  %v2397_v54 = vmin.f32 %v846_v0, 1.0 }
  0xd8   : > { %v2399_v12 = vmin.f32 %v847_v50, 1.0  ;;  %vm998_vm3 = vcmp.ge.f32.partialorder %v2312_v1, %v997_v58  ;;  %vm999_vm4 = vcmp.ge.f32.partialorder %v2317_v53, %v997_v58  ;;  %v2403_v60 = vmin.f32 %v848_v34, 1.0 }
  0xd9   : > { %v1000_v15 = vsel %vm998_vm3, %v2279_v25, 11  ;;  %v1001_v7 = vsel %vm999_vm4, %v2389_v47, 11  ;;  %v1093_v29 = vrot.slane %v1092_v14, 1  ;;  %v2407_v18 = vmin.f32 %v849_v31, 1.0 }
  0xda   : > { %v2409_v5 = vmin.f32 %v850_v26, 1.0  ;;  %v1002_v23 = vsel %vm872_vm0, %v1001_v7, 2147483647  ;;  %v2412_v43 = vmul.u32 37449, %v1162_v51  ;;  %v2414_v39 = vmin.f32 %v851_v41, 1.0 }
  0xdb   : > { %v2416_v1 = vmin.f32 %v852_v28, 1.0  ;;  %v2418_v53 = vmin.f32 %v853_v17, 1.0  ;;  %vm1003_vm5 = vcmp.lt.s32.totalorder %v1000_v15, %v1002_v23  ;;  %v2420_v10 = vmin.f32 %v854_v55, 1.0 }
  0xdc   : > { %v1004_v61 = vsel %vm1003_vm5, %v1000_v15, %v1002_v23  ;;  %v1094_v37 = vrot.slane %v1092_v14, 2  ;;  %v1163_v40 = vshrl.u32 %v2386_v49, 16  ;;  %v2423_v63 = vmin.f32 %v855_v27, 1.0 }
  0xdd   : > { %v1005_v35 = vrot.slane %v1004_v61, 4  ;;  %v1095_v32 = vrot.slane %v1092_v14, 3  ;;  %vm1099_vm6 = vcmp.ne.s32.totalorder %v1093_v29, 0  ;;  %v1096_v52 = vrot.slane %v1092_v14, 4 }
  0xde   : > { %v2425_v21 = vmul.u32 9362, %v1162_v51  ;;  %v1169_v59 = vshll.u32 %v2412_v43, 16  ;;  %v2429_v2 = vadd.s32 1, %v2352_v22  ;;  %v2431_v44 = vmin.f32 %v856_v20, 1.0 }
  0xdf   : > { %v2433_v6 = vmin.f32 %v857_v33, 1.0  ;;  %vm1006_vm7 = vcmp.lt.s32.totalorder %v1004_v61, %v1005_v35  ;;  %v1097_v16 = vrot.slane %v1092_v14, 5  ;;  %vm1100_vm8 = vcmp.ne.s32.totalorder %v1094_v37, 0 }
  0xe0   : > { %v1007_v30 = vsel %vm1006_vm7, %v1004_v61, %v1005_v35  ;;  %v1105_v46 = vsel %vm1099_vm6, 1, %v2775_v4  ;;  %v2436_v8 = vmul.u32 9362, %v1163_v40  ;;  %v1098_v9 = vrot.slane %v1092_v14, 6 }
  0xe1   : > { %v1008_v3 = vrot.slane %v1007_v30, 2  ;;  %vm1101_vm9 = vcmp.ne.s32.totalorder %v1095_v32, 0  ;;  %v1111_v11 = vperm.slane %v1092_v14, 0  ;;  %vm1102_vm10 = vcmp.ne.s32.totalorder %v1096_v52, 0 }
  0xe2   : > { %v2438_v36 = vmul.u32 37449, %v1163_v40  ;;  %vm2443_vm11 = vc.u32 %v2425_v21, %v1169_v59  ;;  %vm1103_vm13 = vcmp.ne.s32.totalorder %v1097_v16, 0  ;;  %v1106_v24 = vsel %vm1100_vm8, 1, %v2775_v4 }
  0xe3   : > { %vm1009_vm12 = vcmp.lt.s32.totalorder %v1007_v30, %v1008_v3  ;;  %v1112_v56 = vperm.slane %v1105_v46, 0  ;;  %v1107_v57 = vsel %vm1101_vm9, 1, %v2775_v4  ;;  %v1171_v50 = vshll.u32 %v2436_v8, 16 }
  0xe4   : > { %v1010_v45 = vsel %vm1009_vm12, %v1007_v30, %v1008_v3  ;;  %vm1104_vm14 = vcmp.ne.s32.totalorder %v1098_v9, 0  ;;  %v1108_v34 = vsel %vm1102_vm10, 1, %v2775_v4  ;;  %vm2453_vm2 = vcmp.eq.s32.totalorder %v1111_v11, 1 }
  0xe5   : > { %v1011_v19 = vrot.slane %v1010_v45, 1  ;;  %v2458_v26 = vsel %vm1103_vm13, 1, %v2775_v4  ;;  %v1113_v41 = vperm.slane %v1106_v24, 0  ;;  %v2464_v48 = vsel %vm2443_vm11, 1, %v2775_v4 }
  0xe6   : > { %v1114_v17 = vperm.slane %v1107_v57, 0  ;;  %vm2466_vm4 = vcmp.eq.s32.totalorder %v1112_v56, 1  ;;  %v1125_v27 = vsel %vm2453_vm2, %v2393_v42, 0.0  ;;  %v2476_v14 = vsel %vm1104_vm14, 1, %v2775_v4 }
  0xe7   : > { %vm1012_vm3 = vcmp.lt.s32.totalorder %v1010_v45, %v1011_v19  ;;  %v1115_v51 = vperm.slane %v1108_v34, 0  ;;  %v1126_v20 = vsel %vm2453_vm2, %v2395_v13, 0.0  ;;  %v1127_v29 = vsel %vm2466_vm4, %v2397_v54, 0.0 }
  0xe8   : > { %v2473_v58 = vsel %vm1012_vm3, %v1010_v45, %v1011_v19  ;;  %vm2509_vm7 = vcmp.eq.s32.totalorder %v1113_v41, 1  ;;  %vm2549_vm8 = vcmp.eq.s32.totalorder %v1114_v17, 1  ;;  %vm1228_vm10 = vcmp.lt.s32.totalorder %v2429_v2, 0 }
  0xe9   : > { %vm2483_vm5 = vcmp.eq.s32.totalorder %v2279_v25, %v2473_v58  ;;  %vm2489_vm6 = vcmp.eq.s32.totalorder %v2389_v47, %v2473_v58  ;;  %vm2553_vm9 = vcmp.eq.s32.totalorder %v1115_v51, 1  ;;  %v1129_v51 = vsel %vm2509_vm7, %v2403_v60, 0.0 }
  0xea   : > { %v1022_v23 = vsel %vm2483_vm5, %v2393_v42, 0.0  ;;  %v1023_v61 = vsel %vm2489_vm6, %v2395_v13, 0.0  ;;  %v1024_v37 = vsel %vm2483_vm5, %v2397_v54, 0.0  ;;  %v1025_v40 = vsel %vm2489_vm6, %v2399_v12, 0.0 }
  0xeb   : > { %v1026_v32 = vsel %vm2483_vm5, %v2403_v60, 0.0  ;;  %v1027_v52 = vsel %vm2489_vm6, %v2407_v18, 0.0  ;;  %v1028_v54 = vsel %vm2483_vm5, %v2409_v5, 0.0  ;;  %v1029_v16 = vsel %vm2489_vm6, %v2414_v39, 0.0 }
  0xec   : > { %v1030_v30 = vsel %vm2483_vm5, %v2416_v1, 0.0  ;;  %v1031_v46 = vsel %vm2489_vm6, %v2418_v53, 0.0  ;;  %v1032_v3 = vsel %vm2483_vm5, %v2420_v10, 0.0  ;;  %v1033_v9 = vsel %vm2489_vm6, %v2423_v63, 0.0 }
  0xed   : > { %v1034_v11 = vsel %vm2483_vm5, %v2431_v44, 0.0  ;;  %v1035_v22 = vsel %vm2489_vm6, %v2433_v6, 0.0  ;;  %v1036_v24 = vsel %vm872_vm0, %v1023_v61, 0.0  ;;  %v1044_v56 = vsel %vm872_vm0, %v1025_v40, 0.0 }
  0xee   : > { %v1037_v45 = vadd.f32 %v1036_v24, %v1022_v23  ;;  %v1045_v57 = vadd.f32 %v1044_v56, %v1024_v37  ;;  %v1052_v19 = vsel %vm872_vm0, %v1027_v52, 0.0  ;;  %v1060_v34 = vsel %vm872_vm0, %v1029_v16, 0.0 }
  0xef   : > { %v1053_v41 = vadd.f32 %v1052_v19, %v1026_v32  ;;  %v1061_v7 = vadd.f32 %v1060_v34, %v1028_v54  ;;  %v1068_v28 = vsel %vm872_vm0, %v1031_v46, 0.0  ;;  %v1076_v33 = vsel %vm872_vm0, %v1033_v9, 0.0 }
  0xf0   : > { %v1038_v15 = vrot.slane %v1037_v45, 4  ;;  %v1046_v61 = vrot.slane %v1045_v57, 4  ;;  %v1069_v0 = vadd.f32 %v1068_v28, %v1030_v30  ;;  %v1077_v40 = vadd.f32 %v1076_v33, %v1032_v3 }
  0xf1   : > { %v1054_v37 = vrot.slane %v1053_v41, 4  ;;  %v1062_v52 = vrot.slane %v1061_v7, 4  ;;  %v1084_v32 = vsel %vm872_vm0, %v1035_v22, 0.0  ;;  %v1128_v54 = vsel %vm2466_vm4, %v2399_v12, 0.0 }
  0xf2   : > { %v1039_v17 = vadd.f32 %v1038_v15, %v1037_v45  ;;  %v1047_v16 = vadd.f32 %v1046_v61, %v1045_v57  ;;  %v1070_v46 = vrot.slane %v1069_v0, 4  ;;  %v1078_v9 = vrot.slane %v1077_v40, 4 }
  0xf3   : > { %v1055_v24 = vadd.f32 %v1054_v37, %v1053_v41  ;;  %v1063_v56 = vadd.f32 %v1062_v52, %v1061_v7  ;;  %v1085_v28 = vadd.f32 %v1084_v32, %v1034_v11  ;;  %v1130_v12 = vsel %vm2509_vm7, %v2407_v18, 0.0 }
  0xf4   : > { %v1040_v30 = vrot.slane %v1039_v17, 2  ;;  %v1048_v3 = vrot.slane %v1047_v16, 2  ;;  %v1071_v19 = vadd.f32 %v1070_v46, %v1069_v0  ;;  %v1079_v34 = vadd.f32 %v1078_v9, %v1077_v40 }
  0xf5   : > { %v1056_v22 = vrot.slane %v1055_v24, 2  ;;  %v1064_v33 = vrot.slane %v1063_v56, 2  ;;  %v1086_v4 = vrot.slane %v1085_v28, 4  ;;  %v1139_v60 = vadd.f32 %v1127_v29, %v1125_v27 }
  0xf6   : > { %v1041_v55 = vadd.f32 %v1040_v30, %v1039_v17  ;;  %v1049_v45 = vadd.f32 %v1048_v3, %v1047_v16  ;;  %v1072_v57 = vrot.slane %v1071_v19, 2  ;;  %v1080_v7 = vrot.slane %v1079_v34, 2 }
  0xf7   : > { %v1057_v11 = vadd.f32 %v1056_v22, %v1055_v24  ;;  %v1065_v41 = vadd.f32 %v1064_v33, %v1063_v56  ;;  %v1087_v15 = vadd.f32 %v1086_v4, %v1085_v28  ;;  %v1145_v18 = vsel %vm872_vm0, %v1126_v20, 0.0 }
  0xf8   : > { %v1042_v0 = vrot.slane %v1041_v55, 1  ;;  %v1050_v61 = vrot.slane %v1049_v45, 1  ;;  %v1146_v35 = vsel %vm872_vm0, %v1128_v54, 0.0  ;;  %v1073_v37 = vadd.f32 %v1072_v57, %v1071_v19 }
  0xf9   : > { %v1058_v40 = vrot.slane %v1057_v11, 1  ;;  %v1081_v4 = vadd.f32 %v1080_v7, %v1079_v34  ;;  %v1088_v52 = vrot.slane %v1087_v15, 2  ;;  %v1117_v32 = vperm.slane %v2476_v14, 0 }
  0xfa   : > { %v1131_v42 = vsel %vm2549_vm8, %v2409_v5, 0.0  ;;  %v1132_v13 = vsel %vm2549_vm8, %v2414_v39, 0.0  ;;  %v1133_v31 = vsel %vm2553_vm9, %v2416_v1, 0.0  ;;  %v1066_v27 = vrot.slane %v1065_v41, 1 }
  0xfb   : > { %v1089_v20 = vadd.f32 %v1088_v52, %v1087_v15  ;;  %v1134_v29 = vsel %vm2553_vm9, %v2418_v53, 0.0  ;;  %v1148_v54 = vsel %vm872_vm0, %v1130_v12, 0.0  ;;  %v1043_v17 = vadd.f32 %v1042_v0, %v1041_v55 }
  0xfc   : > { %v1051_v16 = vadd.f32 %v1050_v61, %v1049_v45  ;;  %v1140_v46 = vadd.f32 %v1139_v60, %v1129_v51  ;;  %v1147_v5 = vadd.f32 %v1146_v35, %v1145_v18  ;;  %v1059_v9 = vadd.f32 %v1058_v40, %v1057_v11 }
  0xfd   : > { %v1074_v24 = vrot.slane %v1073_v37, 1  ;;  %v1082_v38 = vrot.slane %v1081_v4, 1  ;;  %v1175_v39 = vadd.s32 %v1169_v59, %v2425_v21  ;;  %v1090_v56 = vrot.slane %v1089_v20, 1 }
  0xfe   : > { %v1176_v28 = vadd.s32 %v2464_v48, %v2438_v36  ;;  %vm1205_vm11 = vcmask 1041409   ;;  %vm1207_vm12 = vcmask 1042434   ;;  %v1067_v30 = vadd.f32 %v1066_v27, %v1065_v41 }
  0xff   : > { %v2598_v3 = vsel %vm872_vm0, %v1132_v13, 0.0  ;;  %vm1177_vm13 = vc.u32 %v1175_v39, %v1171_v50  ;;  %v1179_v51 = vadd.s32 %v1175_v39, %v1171_v50  ;;  %v2604_v19 = vadd.f32 %v1140_v46, %v1131_v42 }
 0x100   : > { %v2928_v34 = vmov 0   ;;  %v1206_v59 = vsel %vm1205_vm11, %v1051_v16, %v1043_v17  ;;  %vm1209_vm14 = vcmask 1043459   ;;  %v2607_v22 = vadd.f32 %v1148_v54, %v1147_v5 }
 0x101   : > { %v1178_v21 = vsel %vm1177_vm13, 1, %v2928_v34  ;;  %vm1183_vm2 = vc.u32 %v1179_v51, 2454267026  ;;  %v1208_v48 = vsel %vm1207_vm12, %v1059_v9, %v1206_v59  ;;  %v1075_v33 = vadd.f32 %v1074_v24, %v1073_v37 }
 0x102   : > { %v1180_v36 = vadd.s32 %v1178_v21, %v1176_v28  ;;  %v1083_v12 = vadd.f32 %v1082_v38, %v1081_v4  ;;  %v2609_v55 = vadd.f32 %v1090_v56, %v1089_v20  ;;  %vm1211_vm3 = vcmask 1044484  }
 0x103   : > { %v2929_v45 = vshrl.u32 %v2412_v43, 16  ;;  %v1210_v50 = vsel %vm1209_vm14, %v1067_v30, %v1208_v48  ;;  %v2930_v7 = vsub.s32 0, %v2429_v2  ;;  %v2621_v41 = vadd.s32 10, %v2473_v58 }
 0x104   : > { %v1184_v15 = vsel %vm1183_vm2, 1, %v2928_v34  ;;  %v2627_v43 = vadd.s32 1, %v2473_v58  ;;  %v2931_v61 = vshrl.u32 %v2436_v8, 16  ;;  %vm1213_vm4 = vcmask 1045509  }
 0x105   : > { %v1181_v57 = vadd.s32 %v1180_v36, %v2929_v45  ;;  %v2618_v11 = vsel %vm1228_vm10, %v2930_v7, %v2429_v2  ;;  %vm1276_vm5 = vcmp.lt.s32.totalorder %v2621_v41, 0  ;;  %v1277_v35 = vsub.s32 0, %v2621_v41 }
 0x106   : > { %v1231_v60 = vand.u32 65535, %v2618_v11  ;;  %v1232_v0 = vshrl.u32 %v2618_v11, 16  ;;  %v1212_v40 = vsel %vm1211_vm3, %v1075_v33, %v1210_v50  ;;  %vm1323_vm6 = vcmp.lt.s32.totalorder %v2627_v43, 0 }
 0x107   : > { %v1182_v18 = vadd.s32 %v1181_v57, %v2931_v61  ;;  %v2636_v13 = vsel %vm1276_vm5, %v1277_v35, %v2621_v41  ;;  %v1324_v8 = vsub.s32 0, %v2627_v43  ;;  %vm1215_vm8 = vcmask 1046534  }
 0x108   : > { %v1234_v37 = vmul.u32 9362, %v1231_v60  ;;  %v1235_v4 = vmul.u32 37449, %v1231_v60  ;;  %v1236_v52 = vmul.u32 9362, %v1232_v0  ;;  %v1237_v58 = vmul.u32 37449, %v1232_v0 }
 0x109   : > { %v1185_v42 = vadd.s32 %v1184_v15, %v1182_v18  ;;  %v1279_v16 = vand.u32 65535, %v2636_v13  ;;  %v1280_v46 = vshrl.u32 %v2636_v13, 16  ;;  %v2645_v5 = vsel %vm1323_vm6, %v1324_v8, %v2627_v43 }
 0x10a   : > { %v1238_v27 = vshll.u32 %v1235_v4, 16  ;;  %v1239_v20 = vshrl.u32 %v1235_v4, 16  ;;  %v1240_v54 = vshll.u32 %v1236_v52, 16  ;;  %v1326_v24 = vand.u32 65535, %v2645_v5 }
 0x10b   : > { %v1186_v17 = vshrl.u32 %v1185_v42, 2  ;;  %v1327_v38 = vshrl.u32 %v2645_v5, 16  ;;  %v1282_v28 = vmul.u32 35747, %v1279_v16  ;;  %v1283_v30 = vmul.u32 47662, %v1279_v16 }
 0x10c   : > { %vm1242_vm7 = vc.u32 %v1234_v37, %v1238_v27  ;;  %v1244_v9 = vadd.s32 %v1238_v27, %v1234_v37  ;;  %v1284_v59 = vmul.u32 35747, %v1280_v46  ;;  %v1285_v33 = vmul.u32 47662, %v1280_v46 }
 0x10d   : > { %v1187_v39 = vmul.u32 7, %v1186_v17  ;;  %v1243_v56 = vsel %vm1242_vm7, 1, %v2928_v34  ;;  %v1286_v45 = vshll.u32 %v1283_v30, 16  ;;  %v1214_v57 = vsel %vm1213_vm4, %v1083_v12, %v1212_v40 }
 0x10e   : > { %v1245_v51 = vadd.s32 %v1243_v56, %v1237_v58  ;;  %vm1246_vm11 = vc.u32 %v1244_v9, %v1240_v54  ;;  %v1248_v21 = vadd.s32 %v1244_v9, %v1240_v54  ;;  %v1241_v50 = vshrl.u32 %v1236_v52, 16 }
 0x10f   : > { %v1188_v36 = vsub.s32 %v2386_v49, %v1187_v39  ;;  %v1247_v48 = vsel %vm1246_vm11, 1, %v2928_v34  ;;  %v1288_v0 = vshll.u32 %v1284_v59, 16  ;;  %vm1290_vm13 = vc.u32 %v1282_v28, %v1286_v45 }
 0x110   : > { %v1249_v7 = vadd.s32 %v1247_v48, %v1245_v51  ;;  %vm1252_vm12 = vc.u32 %v1248_v21, 2454267026  ;;  %v2932_v61 = vperm.slane %v2458_v26, 0  ;;  %v1291_v35 = vsel %vm1290_vm13, 1, %v2928_v34 }
 0x111   : > { %v1189_v15 = vsub.s32 0, %v1188_v36  ;;  %v1253_v60 = vsel %vm1252_vm12, 1, %v2928_v34  ;;  %v1292_v37 = vadd.s32 %v1286_v45, %v1282_v28  ;;  %v1329_v4 = vmul.u32 35747, %v1326_v24 }
 0x112   : > { %vm2656_vm14 = vcmp.eq.s32.totalorder %v2932_v61, 1  ;;  %v1250_v49 = vadd.s32 %v1249_v7, %v1239_v20  ;;  %v1293_v40 = vadd.s32 %v1291_v35, %v1285_v33  ;;  %v1330_v52 = vmul.u32 47662, %v1326_v24 }
 0x113   : > { %v1190_v12 = vsel %vm1159_vm15, %v1189_v15, %v1188_v36  ;;  %v1331_v42 = vmul.u32 35747, %v1327_v38  ;;  %vm2665_vm2 = vcmp.eq.s32.totalorder %v1117_v32, 1  ;;  %v1287_v27 = vshrl.u32 %v1283_v30, 16 }
 0x114   : > { %vm1191_vm3 = vcmp.ne.s32.totalorder %v1190_v12, 0  ;;  %vm1192_vm4 = vcmp.lt.s32.totalorder %v1190_v12, 0  ;;  %v1194_v26 = vadd.s32 7, %v1190_v12  ;;  %v1251_v58 = vadd.s32 %v1250_v49, %v1241_v50 }
 0x115   : > { %vm1193_vm7 = vmand %vm1192_vm4, %vm1191_vm3  ;;  %vm1294_vm11 = vc.u32 %v1292_v37, %v1288_v0  ;;  %v1332_v20 = vmul.u32 47662, %v1327_v38  ;;  %v1333_v54 = vshll.u32 %v1330_v52, 16  ;;  %v1335_v46 = vshll.u32 %v1331_v42, 16 }
 0x116   : > { %v1195_v62 = vsel %vm1193_vm7, %v1194_v26, %v1190_v12  ;;  %v1254_v17 = vadd.s32 %v1253_v60, %v1251_v58  ;;  %v1295_v16 = vsel %vm1294_vm11, 1, %v2928_v34  ;;  %v1289_v14 = vshrl.u32 %v1284_v59, 16 }
 0x117   : > { %v1196_v9 = vperm.slane %v1195_v62, 0  ;;  %v1297_v32 = vadd.s32 %v1295_v16, %v1293_v40  ;;  %vm1337_vm15 = vc.u32 %v1329_v4, %v1333_v54  ;;  %v1142_v24 = vadd.f32 %v2604_v19, %v1133_v31 }
 0x118   : > { %v1255_v39 = vshrl.u32 %v1254_v17, 2  ;;  %v1338_v56 = vsel %vm1337_vm15, 1, %v2928_v34  ;;  %v1339_v38 = vadd.s32 %v1333_v54, %v1329_v4  ;;  %v1216_v28 = vsel %vm1215_vm8, %v2609_v55, %v1214_v57 }
 0x119   : > { %vm1197_vm12 = vcmp.eq.s32.totalorder %v2279_v25, %v1196_v9  ;;  %v1298_v30 = vadd.s32 %v1297_v32, %v1287_v27  ;;  %v1340_v51 = vadd.s32 %v1338_v56, %v1332_v20  ;;  %v1151_v21 = vadd.f32 %v2598_v3, %v2607_v22 }
 0x11a   : > { %v1256_v59 = vmul.u32 7, %v1255_v39  ;;  %v1334_v36 = vshrl.u32 %v1330_v52, 16  ;;  %vm1341_vm13 = vc.u32 %v1339_v38, %v1335_v46  ;;  %v1152_v1 = vsel %vm872_vm0, %v1134_v29, 0.0 }
 0x11b   : > { %vm1219_vm3 = vcmask 1046528   ;;  %v1299_v31 = vadd.s32 %v1298_v30, %v1289_v14  ;;  %v1342_v19 = vsel %vm1341_vm13, 1, %v2928_v34  ;;  %v1218_v48 = vsel %vm1197_vm12, %v1216_v28, 0.0 }
 0x11c   : > { %v1257_v55 = vsub.s32 %v2618_v11, %v1256_v59  ;;  %v1336_v33 = vshrl.u32 %v1331_v42, 16  ;;  %v1344_v45 = vadd.s32 %v1342_v19, %v1340_v51  ;;  %v1135_v3 = vsel %vm2656_vm14, %v2420_v10, 0.0 }
 0x11d   : > { %v1136_v23 = vsel %vm2656_vm14, %v2423_v63, 0.0  ;;  %v1300_v53 = vshrl.u32 %v1299_v31, 3  ;;  %v1138_v34 = vsel %vm2665_vm2, %v2433_v6, 0.0  ;;  %v1153_v57 = vadd.f32 %v1152_v1, %v1151_v21 }
 0x11e   : > { %v1258_v22 = vsub.s32 0, %v1257_v55  ;;  %v1345_v29 = vadd.s32 %v1344_v45, %v1334_v36  ;;  %v1220_v11 = vsel %vm1219_vm3, %v1218_v48, 0.0  ;;  %v1143_v7 = vadd.f32 %v1142_v24, %v1135_v3 }
 0x11f   : > { %v1301_v50 = vmul.u32 11, %v1300_v53  ;;  %v1154_v15 = vsel %vm872_vm0, %v1136_v23, 0.0  ;;  %v1137_v6 = vsel %vm2665_vm2, %v2431_v44, 0.0  ;;  %v1221_v61 = vrot.slane %v1220_v11, 4 }
 0x120   : > { %v1259_v10 = vsel %vm1228_vm10, %v1258_v22, %v1257_v55  ;;  %v1346_v60 = vadd.s32 %v1345_v29, %v1336_v33  ;;  %v1155_v49 = vadd.f32 %v1154_v15, %v1153_v57  ;;  %v1156_v4 = vsel %vm872_vm0, %v1138_v34, 0.0  ;;  %v1374_v57 = vld [vmem:[%s615_s21] sm:$0xff] }
 0x121   : > { %vm1260_vm9 = vcmp.ne.s32.totalorder %v1259_v10, 0  ;;  %vm1261_vm8 = vcmp.lt.s32.totalorder %v1259_v10, 0  ;;  %v1263_v63 = vadd.s32 7, %v1259_v10  ;;  %v1302_v0 = vsub.s32 %v2636_v13, %v1301_v50 }
 0x122   : > { %vm1262_vm14 = vmand %vm1261_vm8, %vm1260_vm9  ;;  %v1347_v18 = vshrl.u32 %v1346_v60, 3  ;;  %v1144_v40 = vadd.f32 %v1143_v7, %v1137_v6  ;;  %v1222_v42 = vadd.f32 %v1221_v61, %v1220_v11  ;;  %v1157_v44 = vadd.f32 %v1156_v4, %v1155_v49 }
 0x123   : > { %v1264_v35 = vsel %vm1262_vm14, %v1263_v63, %v1259_v10  ;;  %v1303_v37 = vsub.s32 0, %v1302_v0  ;;  %vm1376_vm8 = vcmask 1043456  }
 0x124   : > { %v1265_v2 = vperm.slane %v1264_v35, 0  ;;  %v1348_v12 = vmul.u32 11, %v1347_v18  ;;  %v1223_v62 = vrot.slane %v1222_v42, 2 }
 0x125   : > { %v1304_v52 = vsel %vm1276_vm5, %v1303_v37, %v1302_v0 }
 0x126   : > { %vm1266_vm10 = vcmp.eq.s32.totalorder %v2279_v25, %v1265_v2  ;;  %vm1305_vm4 = vcmp.ne.s32.totalorder %v1304_v52, 0  ;;  %vm1306_vm7 = vcmp.lt.s32.totalorder %v1304_v52, 0  ;;  %v1308_v8 = vadd.s32 11, %v1304_v52 }
 0x127   : > { %v1267_v13 = vsel %vm1266_vm10, %v1216_v28, 0.0  ;;  %vm1307_vm2 = vmand %vm1306_vm7, %vm1305_vm4  ;;  %v1349_v26 = vsub.s32 %v2645_v5, %v1348_v12  ;;  %v1224_v24 = vadd.f32 %v1223_v62, %v1222_v42 }
 0x128   : > { %v1268_v58 = vsel %vm1219_vm3, %v1267_v13, 0.0  ;;  %v1309_v20 = vsel %vm1307_vm2, %v1308_v8, %v1304_v52 }
 0x129   : > { %v1269_v27 = vrot.slane %v1268_v58, 4  ;;  %v1350_v54 = vsub.s32 0, %v1349_v26  ;;  %vm1310_vm11 = vcmp.eq.s32.totalorder %v2279_v25, %v1309_v20  ;;  %vm1311_vm5 = vcmp.eq.s32.totalorder %v2389_v47, %v1309_v20 }
 0x12a   : > { %v1312_v17 = vsel %vm1310_vm11, %v1144_v40, 0.0  ;;  %v1313_v16 = vsel %vm1311_vm5, %v1157_v44, 0.0  ;;  %v1225_v21 = vrot.slane %v1224_v24, 1 }
 0x12b   : > { %v1270_v41 = vadd.f32 %v1269_v27, %v1268_v58  ;;  %v1351_v46 = vsel %vm1323_vm6, %v1350_v54, %v1349_v26  ;;  %v1314_v9 = vsel %vm872_vm0, %v1313_v16, 0.0  ;;  %vm1370_vm6 = vcmask 1041408  }
 0x12c   : > { %vm1352_vm15 = vcmp.ne.s32.totalorder %v1351_v46, 0  ;;  %vm1353_vm12 = vcmp.lt.s32.totalorder %v1351_v46, 0  ;;  %v1355_v5 = vadd.s32 11, %v1351_v46  ;;  %v1315_v32 = vadd.f32 %v1314_v9, %v1312_v17 }
 0x12d   : > { %v1271_v14 = vrot.slane %v1270_v41, 2  ;;  %vm1354_vm13 = vmand %vm1353_vm12, %vm1352_vm15  ;;  %v1226_v48 = vadd.f32 %v1225_v21, %v1224_v24 }
 0x12e   : > { %v1356_v39 = vsel %vm1354_vm13, %v1355_v5, %v1351_v46  ;;  %v1316_v38 = vrot.slane %v1315_v32, 4 }
 0x12f   : > { %v1272_v56 = vadd.f32 %v1271_v14, %v1270_v41  ;;  %vm1357_vm3 = vcmp.eq.s32.totalorder %v2279_v25, %v1356_v39  ;;  %vm1358_vm9 = vcmp.eq.s32.totalorder %v2389_v47, %v1356_v39 }
 0x130   : > { %v1359_v43 = vsel %vm1357_vm3, %v1144_v40, 0.0  ;;  %v1360_v28 = vsel %vm1358_vm9, %v1157_v44, 0.0  ;;  %v1317_v30 = vadd.f32 %v1316_v38, %v1315_v32 }
 0x131   : > { %v1361_v51 = vsel %vm872_vm0, %v1360_v28, 0.0  ;;  %v1273_v59 = vrot.slane %v1272_v56, 1 }
 0x132   : > { %v1362_v36 = vadd.f32 %v1361_v51, %v1359_v43  ;;  %v1318_v1 = vrot.slane %v1317_v30, 2 }
 0x133   : > { %v1274_v55 = vadd.f32 %v1273_v59, %v1272_v56 }
 0x134   : > { %v1363_v31 = vrot.slane %v1362_v36, 4  ;;  %v1319_v19 = vadd.f32 %v1318_v1, %v1317_v30 }
 0x135   : > { %v1369_v23 = vsel %vm957_vm1, %v1226_v48, %v1274_v55 }
 0x136   : > { %v1364_v25 = vadd.f32 %v1363_v31, %v1362_v36  ;;  %v1320_v33 = vrot.slane %v1319_v19, 1 }
 0x138   : > { %v1365_v47 = vrot.slane %v1364_v25, 2  ;;  %v1321_v45 = vadd.f32 %v1320_v33, %v1319_v19 }
 0x13a   : > { %v1366_v3 = vadd.f32 %v1365_v47, %v1364_v25  ;;  %v1371_v22 = vsel %vm1370_vm6, %v1369_v23, %v1321_v45 }
 0x13c   : > { %v1367_v53 = vrot.slane %v1366_v3, 1 }
 0x13e   : > { %v1368_v29 = vadd.f32 %v1367_v53, %v1366_v3 }
 0x140   : > { %v1372_v34 = vsel %vm872_vm0, %v1371_v22, %v1368_v29 }
 0x141   : > { %v1373_v11 = vsub.f32 1.0, %v1372_v34 }
 0x143   : > { %v1375_v50 = vmul.f32 %v1374_v57, %v1373_v11 }
 0x145   : > { %v1377_v7 = vsel %vm1376_vm8, %v1375_v50, %v1374_v57 }
 0x146   : > { %1378 = vst [vmem:[%s619_s15] sm:$0xff] %v1377_v7 }
 0x147 PF: > { %p10_p9 = scmp.ge.s32.totalorder %s1570_s16, 4   ;;  %s2937_s12 = smov %s1526_s13 }
 0x148   : > { %s2938_s13 = smov %s1579_s19  ;;  %s2939_s14 = smov %s1570_s16 }
 0x149   :  { %12 = sbr.rel (!%p10_p9) target bundleno = 2 (0x2), region = 160 }

</bundles_post_ra>
